<compile_context>
chip_gen: v7x
topology: tpu7x:2x2x1
jax: 0.10.0
libtpu: 0.0.40
codegen_flags: <defaults>
</compile_context>

<pallas_src>
import jax
import jax.numpy as jnp
from jax.experimental import pallas as pl
from jax.experimental.pallas import tpu as pltpu

# ----------------------- small config (module defaults: heads=8, dim_head=64) --
B = 2                       # batch
N = 16                      # sequence length (sublane multiple of 8)
DIM = 128                   # model dim (lane-dense)
HEADS = 8
DIM_HEAD = 64
INNER = HEADS * DIM_HEAD    # 512
HN = HEADS * N              # 128 (packed score lane width)
SCALE = DIM_HEAD ** -0.5


# ----------------------- fused attention kernel (one batch element / grid step) -
def attention_kernel(x_ref, wq_ref, wkT_ref, wv_ref, wo_ref, ones_ref, bo_ref,
                     o_ref, ktbd_ref, vbd_ref):
    # x_ref   : (1, N, DIM) f32
    # wq_ref  : (DIM, INNER) bf16   (attention scale folded in host-side)
    # wkT_ref : (INNER, DIM) bf16   (PyTorch layout as-is: K^T = wkT @ x^T)
    # wv_ref  : (DIM, INNER) bf16
    # wo_ref  : (INNER, DIM) bf16
    # ones_ref: (HN, HN)     bf16   constant block-diag ones (per-head segment sums)
    # bo_ref  : (1, DIM)     f32
    # o_ref   : (1, N, DIM)  f32
    # ktbd_ref: (INNER, HN)  bf16 scratch — block-diagonal K^T staging
    # vbd_ref : (HN, INNER)  bf16 scratch — block-diagonal V  staging
    x = x_ref[0]                                   # (N, DIM) f32
    xb = x.astype(jnp.bfloat16)
    xTb = x.T.astype(jnp.bfloat16)                 # single shared transpose

    # ---- fused projections: 3 wide MXU matmuls (no per-head dots) ----
    q = jnp.dot(xb, wq_ref[...], preferred_element_type=jnp.float32)     # (N, INNER)
    v = jnp.dot(xb, wv_ref[...], preferred_element_type=jnp.float32)     # (N, INNER)
    kT = jnp.dot(wkT_ref[...], xTb, preferred_element_type=jnp.float32)  # (INNER, N)

    qb = q.astype(jnp.bfloat16)
    vb = v.astype(jnp.bfloat16)
    kTb = kT.astype(jnp.bfloat16)

    # ---- stage block-diagonal K^T and V (zero + per-head diagonal block stores) ----
    ktbd_ref[...] = jnp.zeros((INNER, HN), jnp.bfloat16)
    vbd_ref[...] = jnp.zeros((HN, INNER), jnp.bfloat16)
    for h in range(HEADS):                         # static offsets; stores only (no matmuls)
        r0 = h * DIM_HEAD
        c0 = h * N
        ktbd_ref[r0:r0 + DIM_HEAD, c0:c0 + N] = kTb[r0:r0 + DIM_HEAD, :]
        vbd_ref[c0:c0 + N, r0:r0 + DIM_HEAD] = vb[:, r0:r0 + DIM_HEAD]

    # ---- all-head scores in ONE wide matmul; lane-dense softmax on (N, H*N) ----
    s = jnp.dot(qb, ktbd_ref[...], preferred_element_type=jnp.float32)   # (N, HN)
    # Row-global max is a constant per head segment -> softmax unchanged, exponents <= 0.
    s = s - jnp.max(s, axis=-1, keepdims=True)
    p = jnp.exp(s)                                                       # f32, full-lane
    # Per-head segment sums, broadcast within each 16-lane segment, via block-diag ones.
    seg = jnp.dot(p.astype(jnp.bfloat16), ones_ref[...],
                  preferred_element_type=jnp.float32)                    # (N, HN)
    attn = p * pl.reciprocal(seg, approx=True)                           # f32 stats

    # ---- all-head attn @ V in ONE wide matmul; columns already in '(h d)' order ----
    o = jnp.dot(attn.astype(jnp.bfloat16), vbd_ref[...],
                preferred_element_type=jnp.float32)                      # (N, INNER)

    # ---- output projection: single dot, MXU accumulates over K=512 ----
    out = jnp.dot(o.astype(jnp.bfloat16), wo_ref[...],
                  preferred_element_type=jnp.float32) + bo_ref[...]      # (N, DIM)
    o_ref[0] = out


# ----------------------- host-side weight preparation (run ONCE at init) -------
def prep_weights(w_qkv, w_out, b_out):
    """Rearrange PyTorch-layout weights into kernel-ready bf16 stacks.

    w_qkv : (3*INNER, DIM)  == nn.Linear(dim, 3*inner, bias=False).weight
    w_out : (DIM, INNER)    == nn.Linear(inner, dim).weight
    b_out : (DIM,)          == nn.Linear(inner, dim).bias
    """
    wq, wk, wv = jnp.split(w_qkv, 3, axis=0)                  # each (INNER, DIM)
    wq_rhs = (wq.T * SCALE).astype(jnp.bfloat16)              # (DIM, INNER), scale folded
    wkT = wk.astype(jnp.bfloat16)                             # (INNER, DIM): K^T = wkT @ x^T
    wv_rhs = wv.T.astype(jnp.bfloat16)                        # (DIM, INNER)
    wo_rhs = w_out.T.astype(jnp.bfloat16)                     # (INNER, DIM)
    bias = b_out.reshape(1, DIM).astype(jnp.float32)
    idx = jnp.arange(HN)
    ones_bd = (idx[:, None] // N == idx[None, :] // N).astype(jnp.bfloat16)  # (HN, HN)
    return wq_rhs, wkT, wv_rhs, wo_rhs, ones_bd, bias


# ----------------------- wrapper ------------------------------------------------
@jax.jit
def attention_forward(x, wq_rhs, wkT, wv_rhs, wo_rhs, ones_bd, bias):
    return pl.pallas_call(
        attention_kernel,
        out_shape=jax.ShapeDtypeStruct((B, N, DIM), jnp.float32),
        grid=(B,),                                            # parallel over batch (v7x: 2 TCs)
        in_specs=[
            pl.BlockSpec((1, N, DIM), lambda b: (b, 0, 0)),   # x[b]
            pl.BlockSpec((DIM, INNER), lambda b: (0, 0)),     # Wq (scaled), resident
            pl.BlockSpec((INNER, DIM), lambda b: (0, 0)),     # Wk^T-form, resident
            pl.BlockSpec((DIM, INNER), lambda b: (0, 0)),     # Wv, resident
            pl.BlockSpec((INNER, DIM), lambda b: (0, 0)),     # Wo, resident
            pl.BlockSpec((HN, HN), lambda b: (0, 0)),         # block-diag ones
            pl.BlockSpec((1, DIM), lambda b: (0, 0)),         # bias
        ],
        out_specs=pl.BlockSpec((1, N, DIM), lambda b: (b, 0, 0)),
        scratch_shapes=[
            pltpu.VMEM((INNER, HN), jnp.bfloat16),            # block-diag K^T staging
            pltpu.VMEM((HN, INNER), jnp.bfloat16),            # block-diag V staging
        ],
        compiler_params=pltpu.CompilerParams(dimension_semantics=("parallel",)),
    )(x, wq_rhs, wkT, wv_rhs, wo_rhs, ones_bd, bias)


# ----------------------- pure-JAX reference (mirrors the PyTorch module, f32) ---
def attention_reference(x, w_qkv, w_out, b_out):
    qkv = x @ w_qkv.T                                         # (B, N, 3*INNER)
    q, k, v = jnp.split(qkv, 3, axis=-1)

    def to_heads(t):                                          # 'b n (h d) -> b h n d'
        return jnp.transpose(t.reshape(B, N, HEADS, DIM_HEAD), (0, 2, 1, 3))

    q, k, v = map(to_heads, (q, k, v))
    dots = jnp.einsum('bhid,bhjd->bhij', q, k) * SCALE
    attn = jax.nn.softmax(dots, axis=-1)
    out = jnp.einsum('bhij,bhjd->bhid', attn, v)
    out = jnp.transpose(out, (0, 2, 1, 3)).reshape(B, N, INNER)   # 'b h n d -> b n (h d)'
    return out @ w_out.T + b_out                              # to_out Linear (Dropout p=0)


# ----------------------- main ----------------------------------------------------
if __name__ == "__main__":
    key = jax.random.PRNGKey(0)
    kx, kqkv, ko, kb = jax.random.split(key, 4)

    x = jax.random.normal(kx, (B, N, DIM), dtype=jnp.float32)
    w_qkv = jax.random.normal(kqkv, (3 * INNER, DIM), dtype=jnp.float32) * (DIM ** -0.5)
    w_out = jax.random.normal(ko, (DIM, INNER), dtype=jnp.float32) * (INNER ** -0.5)
    b_out = jax.random.normal(kb, (DIM,), dtype=jnp.float32) * 0.02

    # Weight prep happens ONCE here (hoisted out of the per-call path).
    params = prep_weights(w_qkv, w_out, b_out)
    params = tuple(jax.block_until_ready(p) for p in params)

    out = attention_forward(x, *params)
    out = jax.block_until_ready(out)
    assert out.shape == (B, N, DIM) and out.dtype == jnp.float32

    ref = attention_reference(x, w_qkv, w_out, b_out)
    max_err = float(jnp.max(jnp.abs(out - ref)))
    ref_scale = float(jnp.max(jnp.abs(ref)))
    # bf16 MXU operands (per perf review) -> compare with a normalized error bound.
    assert max_err <= 3e-2 * ref_scale + 3e-3, (
        f"kernel output mismatch vs reference (max abs err = {max_err}, "
        f"ref scale = {ref_scale})")

    print("KERNEL_OK")
</pallas_src>

<mosaic_0001>
module attributes {stable_mosaic.version = 11 : i64} {
  func.func @attention_kernel(%arg0: i32, %arg1: memref<1x16x128xf32, #tpu.memory_space<vmem>>, %arg2: memref<128x512xbf16, #tpu.memory_space<vmem>>, %arg3: memref<512x128xbf16, #tpu.memory_space<vmem>>, %arg4: memref<128x512xbf16, #tpu.memory_space<vmem>>, %arg5: memref<512x128xbf16, #tpu.memory_space<vmem>>, %arg6: memref<128x128xbf16, #tpu.memory_space<vmem>>, %arg7: memref<1x128xf32, #tpu.memory_space<vmem>>, %arg8: memref<1x16x128xf32, #tpu.memory_space<vmem>>, %arg9: memref<512x128xbf16, #tpu.memory_space<vmem>>, %arg10: memref<128x512xbf16, #tpu.memory_space<vmem>>) attributes {dimension_semantics = [#tpu.dimension_semantics<parallel>], iteration_bounds = array<i64: 2>, scalar_prefetch = 0 : i64, scratch_operands = 2 : i64, tpu.core_type = #tpu.core_type<tc>, window_params = [{transform_indices = @transform_0, window_bounds = array<i64: 1, 16, 128>}, {pipeline_mode = #tpu.pipeline_mode<synchronous>, transform_indices = @transform_1, window_bounds = array<i64: 128, 512>}, {pipeline_mode = #tpu.pipeline_mode<synchronous>, transform_indices = @transform_2, window_bounds = array<i64: 512, 128>}, {pipeline_mode = #tpu.pipeline_mode<synchronous>, transform_indices = @transform_3, window_bounds = array<i64: 128, 512>}, {pipeline_mode = #tpu.pipeline_mode<synchronous>, transform_indices = @transform_4, window_bounds = array<i64: 512, 128>}, {pipeline_mode = #tpu.pipeline_mode<synchronous>, transform_indices = @transform_5, window_bounds = array<i64: 128, 128>}, {pipeline_mode = #tpu.pipeline_mode<synchronous>, transform_indices = @transform_6, window_bounds = array<i64: 1, 128>}, {transform_indices = @transform_7, window_bounds = array<i64: 1, 16, 128>}]} {
    %c0 = arith.constant 0 : index
    %c0_0 = arith.constant 0 : index
    %c0_1 = arith.constant 0 : index
    %0 = vector.load %arg1[%c0, %c0_0, %c0_1] : memref<1x16x128xf32, #tpu.memory_space<vmem>>, vector<1x16x128xf32>
    %1 = vector.shape_cast %0 : vector<1x16x128xf32> to vector<16x128xf32>
    %2 = arith.truncf %1 : vector<16x128xf32> to vector<16x128xbf16>
    %3 = tpu.transpose %1, [1, 0] : vector<16x128xf32> -> vector<128x16xf32>
    %4 = arith.truncf %3 : vector<128x16xf32> to vector<128x16xbf16>
    %c0_2 = arith.constant 0 : index
    %c0_3 = arith.constant 0 : index
    %5 = vector.load %arg2[%c0_2, %c0_3] : memref<128x512xbf16, #tpu.memory_space<vmem>>, vector<128x512xbf16>
    %cst = arith.constant dense<0.000000e+00> : vector<16x512xf32>
    %6 = tpu.matmul %2, %5, %cst {dimension_numbers = #tpu.dot_dimension_numbers<[1], [0], [0], [1], [0, 0, 1, 1], [], []>} : vector<16x128xbf16>, vector<128x512xbf16>, vector<16x512xf32> -> vector<16x512xf32>
    %c0_4 = arith.constant 0 : index
    %c0_5 = arith.constant 0 : index
    %7 = vector.load %arg4[%c0_4, %c0_5] : memref<128x512xbf16, #tpu.memory_space<vmem>>, vector<128x512xbf16>
    %cst_6 = arith.constant dense<0.000000e+00> : vector<16x512xf32>
    %8 = tpu.matmul %2, %7, %cst_6 {dimension_numbers = #tpu.dot_dimension_numbers<[1], [0], [0], [1], [0, 0, 1, 1], [], []>} : vector<16x128xbf16>, vector<128x512xbf16>, vector<16x512xf32> -> vector<16x512xf32>
    %c0_7 = arith.constant 0 : index
    %c0_8 = arith.constant 0 : index
    %9 = vector.load %arg3[%c0_7, %c0_8] : memref<512x128xbf16, #tpu.memory_space<vmem>>, vector<512x128xbf16>
    %cst_9 = arith.constant dense<0.000000e+00> : vector<512x16xf32>
    %10 = tpu.matmul %9, %4, %cst_9 {dimension_numbers = #tpu.dot_dimension_numbers<[1], [0], [0], [1], [0, 0, 1, 1], [], []>} : vector<512x128xbf16>, vector<128x16xbf16>, vector<512x16xf32> -> vector<512x16xf32>
    %11 = arith.truncf %6 : vector<16x512xf32> to vector<16x512xbf16>
    %12 = arith.truncf %8 : vector<16x512xf32> to vector<16x512xbf16>
    %13 = arith.truncf %10 : vector<512x16xf32> to vector<512x16xbf16>
    %cst_10 = arith.constant 0.000000e+00 : bf16
    %14 = vector.broadcast %cst_10 : bf16 to vector<512x128xbf16>
    %c0_11 = arith.constant 0 : index
    %c0_12 = arith.constant 0 : index
    %15 = vector.load %arg9[%c0_11, %c0_12] : memref<512x128xbf16, #tpu.memory_space<vmem>>, vector<512x128xbf16>
    tpu.vector_store %arg9[%c0_11, %c0_12], %14 {strides = array<i32>} : memref<512x128xbf16, #tpu.memory_space<vmem>>, vector<512x128xbf16>,
    %cst_13 = arith.constant 0.000000e+00 : bf16
    %16 = vector.broadcast %cst_13 : bf16 to vector<128x512xbf16>
    %c0_14 = arith.constant 0 : index
    %c0_15 = arith.constant 0 : index
    %17 = vector.load %arg10[%c0_14, %c0_15] : memref<128x512xbf16, #tpu.memory_space<vmem>>, vector<128x512xbf16>
    tpu.vector_store %arg10[%c0_14, %c0_15], %16 {strides = array<i32>} : memref<128x512xbf16, #tpu.memory_space<vmem>>, vector<128x512xbf16>,
    %18 = vector.extract_strided_slice %13 {offsets = [0, 0], sizes = [64, 16], strides = [1, 1]} : vector<512x16xbf16> to vector<64x16xbf16>
    %c0_16 = arith.constant 0 : index
    %c0_17 = arith.constant 0 : index
    %19 = vector.load %arg9[%c0_16, %c0_17] : memref<512x128xbf16, #tpu.memory_space<vmem>>, vector<64x16xbf16>
    tpu.vector_store %arg9[%c0_16, %c0_17], %18 {strides = array<i32>} : memref<512x128xbf16, #tpu.memory_space<vmem>>, vector<64x16xbf16>,
    %20 = vector.extract_strided_slice %12 {offsets = [0, 0], sizes = [16, 64], strides = [1, 1]} : vector<16x512xbf16> to vector<16x64xbf16>
    %c0_18 = arith.constant 0 : index
    %c0_19 = arith.constant 0 : index
    %21 = vector.load %arg10[%c0_18, %c0_19] : memref<128x512xbf16, #tpu.memory_space<vmem>>, vector<16x64xbf16>
    tpu.vector_store %arg10[%c0_18, %c0_19], %20 {strides = array<i32>} : memref<128x512xbf16, #tpu.memory_space<vmem>>, vector<16x64xbf16>,
    %22 = vector.extract_strided_slice %13 {offsets = [64, 0], sizes = [64, 16], strides = [1, 1]} : vector<512x16xbf16> to vector<64x16xbf16>
    %c64 = arith.constant 64 : index
    %c16 = arith.constant 16 : index
    %23 = vector.load %arg9[%c64, %c16] : memref<512x128xbf16, #tpu.memory_space<vmem>>, vector<64x16xbf16>
    tpu.vector_store %arg9[%c64, %c16], %22 {strides = array<i32>} : memref<512x128xbf16, #tpu.memory_space<vmem>>, vector<64x16xbf16>,
    %24 = vector.extract_strided_slice %12 {offsets = [0, 64], sizes = [16, 64], strides = [1, 1]} : vector<16x512xbf16> to vector<16x64xbf16>
    %c16_20 = arith.constant 16 : index
    %c64_21 = arith.constant 64 : index
    %25 = vector.load %arg10[%c16_20, %c64_21] : memref<128x512xbf16, #tpu.memory_space<vmem>>, vector<16x64xbf16>
    tpu.vector_store %arg10[%c16_20, %c64_21], %24 {strides = array<i32>} : memref<128x512xbf16, #tpu.memory_space<vmem>>, vector<16x64xbf16>,
    %26 = vector.extract_strided_slice %13 {offsets = [128, 0], sizes = [64, 16], strides = [1, 1]} : vector<512x16xbf16> to vector<64x16xbf16>
    %c128 = arith.constant 128 : index
    %c32 = arith.constant 32 : index
    %27 = vector.load %arg9[%c128, %c32] : memref<512x128xbf16, #tpu.memory_space<vmem>>, vector<64x16xbf16>
    tpu.vector_store %arg9[%c128, %c32], %26 {strides = array<i32>} : memref<512x128xbf16, #tpu.memory_space<vmem>>, vector<64x16xbf16>,
    %28 = vector.extract_strided_slice %12 {offsets = [0, 128], sizes = [16, 64], strides = [1, 1]} : vector<16x512xbf16> to vector<16x64xbf16>
    %c32_22 = arith.constant 32 : index
    %c128_23 = arith.constant 128 : index
    %29 = vector.load %arg10[%c32_22, %c128_23] : memref<128x512xbf16, #tpu.memory_space<vmem>>, vector<16x64xbf16>
    tpu.vector_store %arg10[%c32_22, %c128_23], %28 {strides = array<i32>} : memref<128x512xbf16, #tpu.memory_space<vmem>>, vector<16x64xbf16>,
    %30 = vector.extract_strided_slice %13 {offsets = [192, 0], sizes = [64, 16], strides = [1, 1]} : vector<512x16xbf16> to vector<64x16xbf16>
    %c192 = arith.constant 192 : index
    %c48 = arith.constant 48 : index
    %31 = vector.load %arg9[%c192, %c48] : memref<512x128xbf16, #tpu.memory_space<vmem>>, vector<64x16xbf16>
    tpu.vector_store %arg9[%c192, %c48], %30 {strides = array<i32>} : memref<512x128xbf16, #tpu.memory_space<vmem>>, vector<64x16xbf16>,
    %32 = vector.extract_strided_slice %12 {offsets = [0, 192], sizes = [16, 64], strides = [1, 1]} : vector<16x512xbf16> to vector<16x64xbf16>
    %c48_24 = arith.constant 48 : index
    %c192_25 = arith.constant 192 : index
    %33 = vector.load %arg10[%c48_24, %c192_25] : memref<128x512xbf16, #tpu.memory_space<vmem>>, vector<16x64xbf16>
    tpu.vector_store %arg10[%c48_24, %c192_25], %32 {strides = array<i32>} : memref<128x512xbf16, #tpu.memory_space<vmem>>, vector<16x64xbf16>,
    %34 = vector.extract_strided_slice %13 {offsets = [256, 0], sizes = [64, 16], strides = [1, 1]} : vector<512x16xbf16> to vector<64x16xbf16>
    %c256 = arith.constant 256 : index
    %c64_26 = arith.constant 64 : index
    %35 = vector.load %arg9[%c256, %c64_26] : memref<512x128xbf16, #tpu.memory_space<vmem>>, vector<64x16xbf16>
    tpu.vector_store %arg9[%c256, %c64_26], %34 {strides = array<i32>} : memref<512x128xbf16, #tpu.memory_space<vmem>>, vector<64x16xbf16>,
    %36 = vector.extract_strided_slice %12 {offsets = [0, 256], sizes = [16, 64], strides = [1, 1]} : vector<16x512xbf16> to vector<16x64xbf16>
    %c64_27 = arith.constant 64 : index
    %c256_28 = arith.constant 256 : index
    %37 = vector.load %arg10[%c64_27, %c256_28] : memref<128x512xbf16, #tpu.memory_space<vmem>>, vector<16x64xbf16>
    tpu.vector_store %arg10[%c64_27, %c256_28], %36 {strides = array<i32>} : memref<128x512xbf16, #tpu.memory_space<vmem>>, vector<16x64xbf16>,
    %38 = vector.extract_strided_slice %13 {offsets = [320, 0], sizes = [64, 16], strides = [1, 1]} : vector<512x16xbf16> to vector<64x16xbf16>
    %c320 = arith.constant 320 : index
    %c80 = arith.constant 80 : index
    %39 = vector.load %arg9[%c320, %c80] : memref<512x128xbf16, #tpu.memory_space<vmem>>, vector<64x16xbf16>
    tpu.vector_store %arg9[%c320, %c80], %38 {strides = array<i32>} : memref<512x128xbf16, #tpu.memory_space<vmem>>, vector<64x16xbf16>,
    %40 = vector.extract_strided_slice %12 {offsets = [0, 320], sizes = [16, 64], strides = [1, 1]} : vector<16x512xbf16> to vector<16x64xbf16>
    %c80_29 = arith.constant 80 : index
    %c320_30 = arith.constant 320 : index
    %41 = vector.load %arg10[%c80_29, %c320_30] : memref<128x512xbf16, #tpu.memory_space<vmem>>, vector<16x64xbf16>
    tpu.vector_store %arg10[%c80_29, %c320_30], %40 {strides = array<i32>} : memref<128x512xbf16, #tpu.memory_space<vmem>>, vector<16x64xbf16>,
    %42 = vector.extract_strided_slice %13 {offsets = [384, 0], sizes = [64, 16], strides = [1, 1]} : vector<512x16xbf16> to vector<64x16xbf16>
    %c384 = arith.constant 384 : index
    %c96 = arith.constant 96 : index
    %43 = vector.load %arg9[%c384, %c96] : memref<512x128xbf16, #tpu.memory_space<vmem>>, vector<64x16xbf16>
    tpu.vector_store %arg9[%c384, %c96], %42 {strides = array<i32>} : memref<512x128xbf16, #tpu.memory_space<vmem>>, vector<64x16xbf16>,
    %44 = vector.extract_strided_slice %12 {offsets = [0, 384], sizes = [16, 64], strides = [1, 1]} : vector<16x512xbf16> to vector<16x64xbf16>
    %c96_31 = arith.constant 96 : index
    %c384_32 = arith.constant 384 : index
    %45 = vector.load %arg10[%c96_31, %c384_32] : memref<128x512xbf16, #tpu.memory_space<vmem>>, vector<16x64xbf16>
    tpu.vector_store %arg10[%c96_31, %c384_32], %44 {strides = array<i32>} : memref<128x512xbf16, #tpu.memory_space<vmem>>, vector<16x64xbf16>,
    %46 = vector.extract_strided_slice %13 {offsets = [448, 0], sizes = [64, 16], strides = [1, 1]} : vector<512x16xbf16> to vector<64x16xbf16>
    %c448 = arith.constant 448 : index
    %c112 = arith.constant 112 : index
    %47 = vector.load %arg9[%c448, %c112] : memref<512x128xbf16, #tpu.memory_space<vmem>>, vector<64x16xbf16>
    tpu.vector_store %arg9[%c448, %c112], %46 {strides = array<i32>} : memref<512x128xbf16, #tpu.memory_space<vmem>>, vector<64x16xbf16>,
    %48 = vector.extract_strided_slice %12 {offsets = [0, 448], sizes = [16, 64], strides = [1, 1]} : vector<16x512xbf16> to vector<16x64xbf16>
    %c112_33 = arith.constant 112 : index
    %c448_34 = arith.constant 448 : index
    %49 = vector.load %arg10[%c112_33, %c448_34] : memref<128x512xbf16, #tpu.memory_space<vmem>>, vector<16x64xbf16>
    tpu.vector_store %arg10[%c112_33, %c448_34], %48 {strides = array<i32>} : memref<128x512xbf16, #tpu.memory_space<vmem>>, vector<16x64xbf16>,
    %c0_35 = arith.constant 0 : index
    %c0_36 = arith.constant 0 : index
    %50 = vector.load %arg9[%c0_35, %c0_36] : memref<512x128xbf16, #tpu.memory_space<vmem>>, vector<512x128xbf16>
    %cst_37 = arith.constant dense<0.000000e+00> : vector<16x128xf32>
    %51 = tpu.matmul %11, %50, %cst_37 {dimension_numbers = #tpu.dot_dimension_numbers<[1], [0], [0], [1], [0, 0, 1, 1], [], []>} : vector<16x512xbf16>, vector<512x128xbf16>, vector<16x128xf32> -> vector<16x128xf32>
    %cst_38 = arith.constant dense<0xFF800000> : vector<16xf32>
    %52 = vector.multi_reduction <maximumf>, %51, %cst_38 [1] : vector<16x128xf32> to vector<16xf32>
    %53 = vector.shape_cast %52 : vector<16xf32> to vector<16x1xf32>
    %54 = vector.broadcast %53 : vector<16x1xf32> to vector<16x128xf32>
    %55 = arith.subf %51, %54 : vector<16x128xf32>
    %56 = math.exp %55 : vector<16x128xf32>
    %57 = arith.truncf %56 : vector<16x128xf32> to vector<16x128xbf16>
    %c0_39 = arith.constant 0 : index
    %c0_40 = arith.constant 0 : index
    %58 = vector.load %arg6[%c0_39, %c0_40] : memref<128x128xbf16, #tpu.memory_space<vmem>>, vector<128x128xbf16>
    %cst_41 = arith.constant dense<0.000000e+00> : vector<16x128xf32>
    %59 = tpu.matmul %57, %58, %cst_41 {dimension_numbers = #tpu.dot_dimension_numbers<[1], [0], [0], [1], [0, 0, 1, 1], [], []>} : vector<16x128xbf16>, vector<128x128xbf16>, vector<16x128xf32> -> vector<16x128xf32>
    %60 = tpu.reciprocal %59 {approx = true} : vector<16x128xf32> -> vector<16x128xf32>
    %61 = arith.mulf %56, %60 : vector<16x128xf32>
    %62 = arith.truncf %61 : vector<16x128xf32> to vector<16x128xbf16>
    %c0_42 = arith.constant 0 : index
    %c0_43 = arith.constant 0 : index
    %63 = vector.load %arg10[%c0_42, %c0_43] : memref<128x512xbf16, #tpu.memory_space<vmem>>, vector<128x512xbf16>
    %cst_44 = arith.constant dense<0.000000e+00> : vector<16x512xf32>
    %64 = tpu.matmul %62, %63, %cst_44 {dimension_numbers = #tpu.dot_dimension_numbers<[1], [0], [0], [1], [0, 0, 1, 1], [], []>} : vector<16x128xbf16>, vector<128x512xbf16>, vector<16x512xf32> -> vector<16x512xf32>
    %65 = arith.truncf %64 : vector<16x512xf32> to vector<16x512xbf16>
    %c0_45 = arith.constant 0 : index
    %c0_46 = arith.constant 0 : index
    %66 = vector.load %arg5[%c0_45, %c0_46] : memref<512x128xbf16, #tpu.memory_space<vmem>>, vector<512x128xbf16>
    %cst_47 = arith.constant dense<0.000000e+00> : vector<16x128xf32>
    %67 = tpu.matmul %65, %66, %cst_47 {dimension_numbers = #tpu.dot_dimension_numbers<[1], [0], [0], [1], [0, 0, 1, 1], [], []>} : vector<16x512xbf16>, vector<512x128xbf16>, vector<16x128xf32> -> vector<16x128xf32>
    %c0_48 = arith.constant 0 : index
    %c0_49 = arith.constant 0 : index
    %68 = vector.load %arg7[%c0_48, %c0_49] : memref<1x128xf32, #tpu.memory_space<vmem>>, vector<1x128xf32>
    %69 = vector.broadcast %68 : vector<1x128xf32> to vector<16x128xf32>
    %70 = arith.addf %67, %69 : vector<16x128xf32>
    %c0_50 = arith.constant 0 : index
    %c0_51 = arith.constant 0 : index
    %c0_52 = arith.constant 0 : index
    %71 = vector.load %arg8[%c0_50, %c0_51, %c0_52] : memref<1x16x128xf32, #tpu.memory_space<vmem>>, vector<1x16x128xf32>
    %72 = vector.shape_cast %71 : vector<1x16x128xf32> to vector<16x128xf32>
    %73 = vector.shape_cast %70 : vector<16x128xf32> to vector<1x16x128xf32>
    tpu.vector_store %arg8[%c0_50, %c0_51, %c0_52], %73 {strides = array<i32>} : memref<1x16x128xf32, #tpu.memory_space<vmem>>, vector<1x16x128xf32>,
    return
  }
  func.func @transform_0(%arg0: i32) -> (i32, i32, i32) {
    %c0_i32 = arith.constant 0 : i32
    %c0_i32_0 = arith.constant 0 : i32
    %c0_i32_1 = arith.constant 0 : i32
    return %arg0, %c0_i32, %c0_i32_0 : i32, i32, i32
  }
  func.func @transform_1(%arg0: i32) -> (i32, i32) {
    %c0_i32 = arith.constant 0 : i32
    %c0_i32_0 = arith.constant 0 : i32
    %c0_i32_1 = arith.constant 0 : i32
    return %c0_i32, %c0_i32_0 : i32, i32
  }
  func.func @transform_2(%arg0: i32) -> (i32, i32) {
    %c0_i32 = arith.constant 0 : i32
    %c0_i32_0 = arith.constant 0 : i32
    %c0_i32_1 = arith.constant 0 : i32
    return %c0_i32, %c0_i32_0 : i32, i32
  }
  func.func @transform_3(%arg0: i32) -> (i32, i32) {
    %c0_i32 = arith.constant 0 : i32
    %c0_i32_0 = arith.constant 0 : i32
    %c0_i32_1 = arith.constant 0 : i32
    return %c0_i32, %c0_i32_0 : i32, i32
  }
  func.func @transform_4(%arg0: i32) -> (i32, i32) {
    %c0_i32 = arith.constant 0 : i32
    %c0_i32_0 = arith.constant 0 : i32
    %c0_i32_1 = arith.constant 0 : i32
    return %c0_i32, %c0_i32_0 : i32, i32
  }
  func.func @transform_5(%arg0: i32) -> (i32, i32) {
    %c0_i32 = arith.constant 0 : i32
    %c0_i32_0 = arith.constant 0 : i32
    %c0_i32_1 = arith.constant 0 : i32
    return %c0_i32, %c0_i32_0 : i32, i32
  }
  func.func @transform_6(%arg0: i32) -> (i32, i32) {
    %c0_i32 = arith.constant 0 : i32
    %c0_i32_0 = arith.constant 0 : i32
    %c0_i32_1 = arith.constant 0 : i32
    return %c0_i32, %c0_i32_0 : i32, i32
  }
  func.func @transform_7(%arg0: i32) -> (i32, i32, i32) {
    %c0_i32 = arith.constant 0 : i32
    %c0_i32_0 = arith.constant 0 : i32
    %c0_i32_1 = arith.constant 0 : i32
    return %arg0, %c0_i32, %c0_i32_0 : i32, i32, i32
  }
}

</mosaic_0001>

<bundles_post_ra>
// kernel: attention_forward.1
= control target key start
LH: loop header
LB: loop body
LE: loop exit
PB: predicated region body
PF: predicated region fallthrough
CT: control target
= control target key end

     0   :  { %s4081_s0 = inlined_call_operand.hbm [shape: f32[2,16,128], index: 0, kind: input, shape index: {}]   ;;  %s4082_s1 = inlined_call_operand.hbm [shape: bf16[128,512], index: 1, kind: input, shape index: {}]   ;;  %s4083_s2 = inlined_call_operand.hbm [shape: bf16[512,128], index: 2, kind: input, shape index: {}]   ;;  %s4084_s3 = inlined_call_operand.hbm [shape: bf16[128,512], index: 3, kind: input, shape index: {}]   ;;  %s4085_s4 = inlined_call_operand.hbm [shape: bf16[512,128], index: 4, kind: input, shape index: {}]   ;;  %s4086_s5 = inlined_call_operand.hbm [shape: bf16[128,128], index: 5, kind: input, shape index: {}]   ;;  %s4087_s6 = inlined_call_operand.vmem [shape: f32[1,128], index: 6, kind: input, shape index: {}]   ;;  %s4088_s7 = inlined_call_operand.hbm [shape: f32[2,16,128], index: 7, kind: output, shape index: {}]  }
   0x1   :  { %4092 = sst [smem:[#allocation21_spill]] %s4082_s1 }
   0x2   :  { %12 = vsyncpa [#allocation5], 0 }
   0x3   :  { %14 = vsyncpa [#allocation5 + $0x1], 0 }
   0x4   :  { %15 = vsyncpa [#allocation8], 0 }
   0x5   :  { %16 = vsyncpa [#allocation11], 0 }
   0x6   :  { %17 = vsyncpa [#allocation14], 0 }
   0x7   :  { %18 = vsyncpa [#allocation6], 0 }
   0x8   :  { %20 = vsyncpa [#allocation6 + $0x1], 0  ;;  %s3627_s24 = smov 0   ;;  %s3629_s25 = smov 0  }
   0x9   :  { %s3631_s26 = smov 0   ;;  %s3633_s27 = smov 0  }
   0xa LB: > { %s3562_s28 = smov [#allocation7]   ;;  %s3648_s30 = sadd.s32 4294967295, %s3560_s27   ;;  %s3560_s27 = sphi %s3633_s27, %s4115_s27   ;;  %s3556_s26 = sphi %s3631_s26, %s4114_s26   ;;  %s3552_s25 = sphi %s3629_s25, %s4113_s25   ;;  %s3548_s24 = sphi %s3627_s24, %s4112_s24  }
   0xb   : > { %s221_s29 = sshll.u32 %s3562_s28, 4  ;;  %p2621_p0 = scmp.ge.s32.totalorder %s3560_s27, 1  ;;  %s3653_s29 = int_to_ptr.vmem [resolvable:$true] %s221_s29 }
   0xc   : > { %p4089_p1 = scmp.eq.s32.totalorder %s3648_s30, 0  ;;  %p209_p2 = scmp.lt.s32.totalorder %s3560_s27, 3 }
   0xd   : > { %s3563_s9 = smov [#allocation10]   ;;  %s3564_s12 = smov [#allocation9]  }
   0xe   : > { %p3655_p3 = pnand %p2621_p0, %p209_p2  ;;  %s247_s10 = sshll.u32 %s3563_s9, 4  ;;  %s3668_s10 = int_to_ptr.vmem [resolvable:$true] %s247_s10 }
   0xf   : > { %s234_s13 = sshll.u32 %s3564_s12, 4  ;;  %s4095_s1 = sld [smem:[#allocation21_spill]]  ;;  %s3670_s13 = int_to_ptr.vmem [resolvable:$true] %s234_s13 }
  0x10   : > { %s4093_s8 = scalar_select %p3655_p3, 1, 0 }
  0x11   : > { %p3044_p5 = pneg %p3655_p3 }
  0x13   : > { %p3664_p6 = pnand %p3044_p5, %p4089_p1 }
  0x15   : > { %s3312_s16 = scalar_lea.hbm %s4095_s1, 4096  ;;  %p3680_p8 = pneg %p3664_p6 }
  0x16   : > { %p3313_p7 = scmp.ne.s32.totalorder %s4095_s1, %s3312_s16  ;;  %p3319_p11 = scmp.lt.u32.totalorder %s3312_s16, %s4095_s1 }
  0x18   : > { %p3315_p9 = pnand %p3680_p8, %p3313_p7 }
  0x1a   : > { %p3316_p10 = pneg %p3315_p9 }
  0x1c   : > { %p3321_p12 = pnand %p3319_p11, %p3316_p10 }
  0x1e   : > { %3324 = shalt.err (!%p3321_p12)
}
  0x1f   : > { %s3325_s22 = scalar_lea.vmem %s3653_s29, 4096  ;;  %p3333_p5 = scmp.lt.s32.totalorder %s3653_s29, %s3653_s29 }
  0x20   : > { %p3326_p13 = scmp.ne.s32.totalorder %s3653_s29, %s3325_s22  ;;  %p3334_p4 = scmp.lt.s32.totalorder %s3325_s22, %s3325_s22 }
  0x22   : > { %p3328_p0 = pnand %p3326_p13, %p3680_p8  ;;  %p3335_p7 = por %p3334_p4, %p3333_p5 }
  0x24   : > { %p3329_p2 = pneg %p3328_p0 }
  0x26   : > { %p3336_p9 = pnand %p3335_p7, %p3329_p2 }
  0x28   : > { %3339 = shalt.err (!%p3336_p9)
}
  0x29   : > { %s3565_s23 = smov 256   ;;  %s3566_s28 = smov 16  }
  0x2a   : > { %3047 = dma.hbm_to_vmem [thread:$0]  (!%p3664_p6), %s4095_s1, 4096, %s3653_s29, [#allocation8], %s3565_s23, %s3565_s23, %s3566_s28  }
  0x2b   : > { %s3340_s16 = scalar_lea.hbm %s4084_s3, 4096 }
  0x2c   : > { %p3341_p4 = scmp.ne.s32.totalorder %s4084_s3, %s3340_s16  ;;  %p3347_p12 = scmp.lt.u32.totalorder %s3340_s16, %s4084_s3 }
  0x2e   : > { %p3343_p10 = pnand %p3341_p4, %p3680_p8 }
  0x30   : > { %p3344_p11 = pneg %p3343_p10 }
  0x32   : > { %p3349_p13 = pnand %p3347_p12, %p3344_p11 }
  0x34   : > { %3352 = shalt.err (!%p3349_p13)
}
  0x35   : > { %s3353_s29 = scalar_lea.vmem %s3668_s10, 4096  ;;  %p3361_p7 = scmp.lt.s32.totalorder %s3668_s10, %s3668_s10 }
  0x36   : > { %p3354_p0 = scmp.ne.s32.totalorder %s3668_s10, %s3353_s29  ;;  %p3362_p9 = scmp.lt.s32.totalorder %s3353_s29, %s3353_s29 }
  0x38   : > { %p3356_p2 = pnand %p3354_p0, %p3680_p8  ;;  %p3363_p4 = por %p3362_p9, %p3361_p7 }
  0x3a   : > { %p3357_p5 = pneg %p3356_p2 }
  0x3c   : > { %p3364_p10 = pnand %p3363_p4, %p3357_p5 }
  0x3e   : > { %3367 = shalt.err (!%p3364_p10)
}
  0x3f   : > { %3053 = dma.hbm_to_vmem [thread:$0]  (!%p3664_p6), %s4084_s3, 4096, %s3668_s10, [#allocation11], %s3565_s23, %s3565_s23, %s3566_s28  }
  0x40   : > { %s3368_s15 = scalar_lea.hbm %s4083_s2, 4096 }
  0x41   : > { %p3369_p11 = scmp.ne.s32.totalorder %s4083_s2, %s3368_s15  ;;  %p3375_p0 = scmp.lt.u32.totalorder %s3368_s15, %s4083_s2 }
  0x43   : > { %p3371_p12 = pnand %p3369_p11, %p3680_p8 }
  0x45   : > { %p3372_p13 = pneg %p3371_p12 }
  0x47   : > { %p3377_p2 = pnand %p3375_p0, %p3372_p13 }
  0x49   : > { %3380 = shalt.err (!%p3377_p2)
}
  0x4a   : > { %s3381_s10 = scalar_lea.vmem %s3670_s13, 4096  ;;  %p3389_p4 = scmp.lt.s32.totalorder %s3670_s13, %s3670_s13 }
  0x4b   : > { %p3382_p5 = scmp.ne.s32.totalorder %s3670_s13, %s3381_s10  ;;  %p3390_p10 = scmp.lt.s32.totalorder %s3381_s10, %s3381_s10 }
  0x4d   : > { %p3384_p7 = pnand %p3382_p5, %p3680_p8  ;;  %p3391_p11 = por %p3390_p10, %p3389_p4 }
  0x4f   : > { %p3385_p9 = pneg %p3384_p7 }
  0x51   : > { %p3392_p12 = pnand %p3391_p11, %p3385_p9 }
  0x53   : > { %3395 = shalt.err (!%p3392_p12)
}
  0x54   : > { %s3567_s23 = smov 64   ;;  %s3568_s28 = smov 4  }
  0x55   : > { %3050 = dma.hbm_to_vmem [thread:$0]  (!%p3664_p6), %s4083_s2, 4096, %s3670_s13, [#allocation8], %s3567_s23, %s3567_s23, %s3568_s28  }
  0x56   : > { %s3569_s22 = smov [#allocation12]   ;;  %s3570_s12 = smov [#allocation13]  }
  0x57   : > { %s260_s9 = sshll.u32 %s3569_s22, 4  ;;  %s273_s14 = sshll.u32 %s3570_s12, 4  ;;  %s261_s9 = int_to_ptr.vmem [resolvable:$true] %s260_s9  ;;  %s274_s14 = int_to_ptr.vmem [resolvable:$true] %s273_s14 }
  0x58   : > { %s3396_s17 = scalar_lea.hbm %s4085_s4, 4096 }
  0x59   : > { %p3397_p13 = scmp.ne.s32.totalorder %s4085_s4, %s3396_s17  ;;  %p3403_p5 = scmp.lt.u32.totalorder %s3396_s17, %s4085_s4 }
  0x5b   : > { %p3399_p0 = pnand %p3397_p13, %p3680_p8 }
  0x5d   : > { %p3400_p2 = pneg %p3399_p0 }
  0x5f   : > { %p3405_p7 = pnand %p3403_p5, %p3400_p2 }
  0x61   : > { %3408 = shalt.err (!%p3405_p7)
}
  0x62   : > { %s3409_s13 = scalar_lea.vmem %s261_s9, 4096  ;;  %p3417_p11 = scmp.lt.s32.totalorder %s261_s9, %s261_s9 }
  0x63   : > { %p3410_p9 = scmp.ne.s32.totalorder %s261_s9, %s3409_s13  ;;  %p3418_p12 = scmp.lt.s32.totalorder %s3409_s13, %s3409_s13 }
  0x65   : > { %p3412_p4 = pnand %p3410_p9, %p3680_p8  ;;  %p3419_p1 = por %p3418_p12, %p3417_p11 }
  0x67   : > { %p3413_p10 = pneg %p3412_p4 }
  0x69   : > { %p3420_p3 = pnand %p3419_p1, %p3413_p10 }
  0x6b   : > { %3423 = shalt.err (!%p3420_p3)
}
  0x6c   : > { %3056 = dma.hbm_to_vmem [thread:$0]  (!%p3664_p6), %s4085_s4, 4096, %s261_s9, [#allocation11], %s3567_s23, %s3567_s23, %s3568_s28  }
  0x6d   : > { %s3424_s12 = scalar_lea.hbm %s4086_s5, 1024 }
  0x6e   : > { %p3425_p1 = scmp.ne.s32.totalorder %s4086_s5, %s3424_s12  ;;  %p3431_p0 = scmp.lt.u32.totalorder %s3424_s12, %s4086_s5 }
  0x70   : > { %p3427_p3 = pnand %p3425_p1, %p3680_p8 }
  0x72   : > { %p3428_p13 = pneg %p3427_p3 }
  0x74   : > { %p3433_p2 = pnand %p3431_p0, %p3428_p13 }
  0x76   : > { %3436 = shalt.err (!%p3433_p2)
}
  0x77   : > { %s3437_s20 = scalar_lea.vmem %s274_s14, 1024  ;;  %p3445_p4 = scmp.lt.s32.totalorder %s274_s14, %s274_s14 }
  0x78   : > { %p3438_p5 = scmp.ne.s32.totalorder %s274_s14, %s3437_s20  ;;  %p3446_p10 = scmp.lt.s32.totalorder %s3437_s20, %s3437_s20 }
  0x7a   : > { %p3440_p7 = pnand %p3438_p5, %p3680_p8  ;;  %p3447_p11 = por %p3446_p10, %p3445_p4 }
  0x7c   : > { %p3441_p9 = pneg %p3440_p7 }
  0x7e   : > { %p3448_p12 = pnand %p3447_p11, %p3441_p9 }
  0x80   : > { %3451 = shalt.err (!%p3448_p12)
}
  0x81   : > { %3059 = dma.hbm_to_vmem [thread:$0]  (!%p3664_p6), %s4086_s5, 1024, %s274_s14, [#allocation14], %s3567_s23, %s3567_s23, %s3568_s28  }
  0x82   : > { %s2620_s11 = sadd.s32 4294967294, %s3560_s27   ;;  %s3794_s19 = sadd.s32 1, %s3560_s27  }
  0x83   : > { %s33_s13 = sadd.s32 1, %s3556_s26  ;;  %s30_s1 = ssub.s32 %s3560_s27, %s3794_s19 }
  0x84   : > { %p40_p8 = scmp.ne.s32.totalorder %s3556_s26, %s3552_s25  ;;  %p31_p1 = scmp.eq.s32.totalorder %s30_s1, 0 }
  0x85   : > { %p41_p3 = scmp.eq.s32.totalorder %s3560_s27, 0  ;;  %p46_p13 = scmp.ne.s32.totalorder %s3552_s25, %s3548_s24 }
  0x86   : > { %p196_p0 = scmp.eq.s32.totalorder %s3648_s30, 1  ;;  %p4097_p5 = scmp.eq.s32.totalorder %s3648_s30, 0 }
  0x87   : > { %s3806_s21 = scalar_select %p31_p1, %s3556_s26, %s33_s13  }
  0x88   : > { %p42_p2 = por %p41_p3, %p40_p8  ;;  %p3810_p7 = por %p4097_p5, %p46_p13 }
  0x89   : > { %p3814_p6 = por %p196_p0, %p40_p8  ;;  %p202_p9 = scmp.eq.s32.totalorder %s2620_s11, 1 }
  0x8a   : > { %p3073_p4 = scmp.lt.s32.totalorder %s3560_s27, 2  ;;  %s290_s28 = sand.u32 1, %s3556_s26  }
  0x8b   : > { %s4099_s23 = scalar_select %p3814_p6, 1, 0 }
  0x8c   : > { %p3820_p10 = por %p202_p9, %p46_p13  ;;  %s2628_s22 = sshll.u32 %s290_s28, 4 }
  0x8d   : > { %s2781_s12 = sshll.u32 %s3560_s27, 8  ;;  %s294_s18 = scalar_lea.vmem [#allocation4], %s2628_s22 }
  0x8e   : > { %s4100_s14 = scalar_select %p3820_p10, 1, 0 }
  0x8f   : > { %s3828_s17 = scalar_lea.hbm %s4081_s0, %s2781_s12  ;;  %s301_s20 = sshll.u32 %s294_s18, 4  ;;  %s3834_s20 = int_to_ptr.vmem [resolvable:$true] %s301_s20 }
  0x90   : > { %p3830_p11 = pnand %p3073_p4, %p42_p2  ;;  %s3836_s10 = scalar_lea.sflag [#allocation5], %s290_s28 }
  0x91   : > { %s3452_s11 = scalar_lea.hbm %s3828_s17, 256  ;;  %s3457_s22 = scalar_lea.hbm %s4081_s0, 512 }
  0x92   : > { %p3453_p12 = scmp.ne.s32.totalorder %s3828_s17, %s3452_s11  ;;  %p3454_p8 = pneg %p3830_p11 }
  0x93   : > { %p3458_p13 = scmp.lt.u32.totalorder %s3828_s17, %s4081_s0  ;;  %p3459_p0 = scmp.lt.u32.totalorder %s3457_s22, %s3452_s11 }
  0x94   : > { %p3455_p1 = pnand %p3454_p8, %p3453_p12  ;;  %p3461_p5 = scmp.lt.u32.totalorder %s3452_s11, %s3828_s17 }
  0x95   : > { %p3460_p2 = por %p3459_p0, %p3458_p13 }
  0x96   : > { %p3456_p3 = pneg %p3455_p1 }
  0x97   : > { %p3462_p9 = por %p3461_p5, %p3460_p2 }
  0x99   : > { %p3463_p4 = pnand %p3462_p9, %p3456_p3 }
  0x9b   : > { %3466 = shalt.err (!%p3463_p4)
}
  0x9c   : > { %s3467_s28 = scalar_lea.vmem %s3834_s20, 256  ;;  %s3571_s16 = smov [#allocation4]  }
  0x9d   : > { %p3468_p12 = scmp.ne.s32.totalorder %s3834_s20, %s3467_s28  ;;  %s3472_s18 = sshll.u32 %s3571_s16, 4  ;;  %s3473_s18 = int_to_ptr.vmem [resolvable:$false] %s3472_s18 }
  0x9e   : > { %s3474_s13 = scalar_lea.vmem %s3473_s18, 512  ;;  %p3475_p6 = scmp.lt.s32.totalorder %s3834_s20, %s3473_s18 }
  0x9f   : > { %p3470_p1 = pnand %p3468_p12, %p3454_p8  ;;  %p3476_p13 = scmp.lt.s32.totalorder %s3474_s13, %s3467_s28 }
  0xa1   : > { %p3471_p10 = pneg %p3470_p1  ;;  %p3477_p0 = por %p3476_p13, %p3475_p6 }
  0xa3   : > { %p3478_p2 = pnand %p3477_p0, %p3471_p10 }
  0xa5   : > { %3481 = shalt.err (!%p3478_p2)
}
  0xa6   : > { %s3572_s11 = smov 128   ;;  %s3573_s1 = smov 8  }
  0xa7   : > { %3063 = dma.hbm_to_vmem [thread:$0]  (!%p3830_p11), %s3828_s17, 256, %s3834_s20, %s3836_s10, %s3572_s11, %s3572_s11, %s3573_s1  }
  0xa8   : > { %p4102_p8 = scmp.ne.s32.totalorder %s4093_s8, 0 }
  0xa9   : > { %s3867_s22 = sand.u32 (!%p4102_p8), 1, %s3552_s25  }
  0xaa   : > { %313 = sbr.rel (%p4102_p8) target bundleno = 1924 (0x784), region = 48  ;;  %s2632_s12 = sshll.u32 (!%p4102_p8), %s3867_s22, 4 }
  0xab   : > { %s316_s15 = scalar_lea.sflag (!%p4102_p8), [#allocation5], %s3867_s22  ;;  %s3873_s28 = scalar_lea.vmem (!%p4102_p8), [#allocation4], %s2632_s12 }
  0xb1   : > { %3527 = dma.done.wait (%p3810_p7), %s316_s15, 256  }
  0xb2   : > { %3529 = vsyncadd (%p3810_p7), %s316_s15, 4294967040  ;;  %p4103_p6 = scmp.eq.s32.totalorder %s3648_s30, 0 }
  0xb4   : > { %3531 = dma.done.wait (%p4103_p6), [#allocation8], 8192   ;;  %p4104_p10 = pmov %p4103_p6 }
  0xb5   : > { %p4105_p11 = pmov %p4103_p6 }
  0xb6   : > { %3533 = vsyncadd (%p4104_p10), [#allocation8], 4294959104 }
  0xb7   : > { %3535 = dma.done.wait (%p4105_p11), [#allocation11], 8192   ;;  %p4106_p3 = pmov %p4103_p6 }
  0xb9   : > { %3537 = vsyncadd (%p4106_p3), [#allocation11], 4294959104  ;;  %p4107_p5 = pmov %p4106_p3 }
  0xba   : > { %p4108_p9 = pmov %p4106_p3 }
  0xbb   : > { %3539 = dma.done.wait (%p4107_p5), [#allocation14], 1024  }
  0xbc   : > { %3541 = vsyncadd (%p4108_p9), [#allocation14], 4294966272  ;;  %v3574_v0 = vmov 0   ;;  %v371_v1 = vld [vmem:[%s3873_s28] sm:$0xff]  ;;  %v372_v2 = vld [vmem:[%s3873_s28 + $0x8] sm:$0xff]  ;;  %vm1624_vm0 = vcmask 523264  }
  0xbd   : > { %638 = vmatprep.mubr.bf16.mxu0 %v3574_v0  ;;  %1555 = vst [vmem:[#allocation2] sm:$0xff] %v3574_v0  ;;  %1556 = vst [vmem:[#allocation2 + $0x8] sm:$0xff] %v3574_v0  ;;  %681 = vmatprep.mubr.bf16.mxu1 %v3574_v0  ;;  %v3135_v3 = vld [vmem:[#allocation7 + $0x4] ss:$16 sps:$4 sm:$0xff]   ;;  %v3137_v4 = vld [vmem:[#allocation7] ss:$16 sps:$4 sm:$0xff]   ;;  %v3935_v21 = vpack.c.bf16 %v372_v2, %v371_v1 }
  0xbe   : > { %1557 = vst [vmem:[#allocation2 + $0x10] sm:$0xff] %v3574_v0  ;;  %1558 = vst [vmem:[#allocation2 + $0x18] sm:$0xff] %v3574_v0  ;;  %374 = vxpose.xlu0.b32.start [1/2] (short) %v371_v1, 128  ;;  %v3138_v5 = vld [vmem:[#allocation7 + $0x24] ss:$16 sps:$4 sm:$0xff]   ;;  %606 = vmatprep.subr.bf16.mxu0 %v3135_v3  ;;  %v3140_v6 = vld [vmem:[#allocation7 + $0x20] ss:$16 sps:$4 sm:$0xff]  }
  0xbf   : > { %1559 = vst [vmem:[#allocation2 + $0x20] sm:$0xff] %v3574_v0  ;;  %1560 = vst [vmem:[#allocation2 + $0x28] sm:$0xff] %v3574_v0  ;;  %607 = vmatpush1.bf16.msra.mxu0 %v3137_v4  ;;  %v3141_v7 = vld [vmem:[#allocation7 + $0x44] ss:$16 sps:$4 sm:$0xff]   ;;  %v3143_v8 = vld [vmem:[#allocation7 + $0x40] ss:$16 sps:$4 sm:$0xff]  }
  0xc0   : > { %1561 = vst [vmem:[#allocation2 + $0x30] sm:$0xff] %v3574_v0  ;;  %1562 = vst [vmem:[#allocation2 + $0x38] sm:$0xff] %v3574_v0  ;;  %608 = vmatprep.subr.bf16.mxu0 %v3138_v5  ;;  %v3144_v9 = vld [vmem:[#allocation7 + $0x64] ss:$16 sps:$4 sm:$0xff]   ;;  %v3146_v10 = vld [vmem:[#allocation7 + $0x60] ss:$16 sps:$4 sm:$0xff]  }
  0xc1   : > { %1563 = vst [vmem:[#allocation2 + $0x40] sm:$0xff] %v3574_v0  ;;  %1564 = vst [vmem:[#allocation2 + $0x48] sm:$0xff] %v3574_v0  ;;  %v3147_v11 = vld [vmem:[#allocation7 + $0x84] ss:$16 sps:$4 sm:$0xff]   ;;  %v3149_v12 = vld [vmem:[#allocation7 + $0x80] ss:$16 sps:$4 sm:$0xff]  }
  0xc2   : > { %1565 = vst [vmem:[#allocation2 + $0x50] sm:$0xff] %v3574_v0  ;;  %1566 = vst [vmem:[#allocation2 + $0x58] sm:$0xff] %v3574_v0  ;;  %375 = vxpose.xlu0.b32.end [2/2] (short) %v372_v2, 128  ;;  %v3150_v13 = vld [vmem:[#allocation7 + $0xa4] ss:$16 sps:$4 sm:$0xff]   ;;  %v3152_v14 = vld [vmem:[#allocation7 + $0xa0] ss:$16 sps:$4 sm:$0xff]  }
  0xc3   : > { %1567 = vst [vmem:[#allocation2 + $0x60] sm:$0xff] %v3574_v0  ;;  %1568 = vst [vmem:[#allocation2 + $0x68] sm:$0xff] %v3574_v0  ;;  %609 = vmatpush1.bf16.msra.mxu0 %v3140_v6  ;;  %v3153_v15 = vld [vmem:[#allocation7 + $0xc4] ss:$16 sps:$4 sm:$0xff]   ;;  %v3155_v16 = vld [vmem:[#allocation7 + $0xc0] ss:$16 sps:$4 sm:$0xff]  }
  0xc4   : > { %1569 = vst [vmem:[#allocation2 + $0x70] sm:$0xff] %v3574_v0  ;;  %1570 = vst [vmem:[#allocation2 + $0x78] sm:$0xff] %v3574_v0  ;;  %610 = vmatprep.subr.bf16.mxu0 %v3141_v7  ;;  %v3156_v17 = vld [vmem:[#allocation7 + $0xe4] ss:$16 sps:$4 sm:$0xff]   ;;  %v3158_v18 = vld [vmem:[#allocation7 + $0xe0] ss:$16 sps:$4 sm:$0xff]  }
  0xc5   : > { %1571 = vst [vmem:[#allocation2 + $0x80] sm:$0xff] %v3574_v0  ;;  %1572 = vst [vmem:[#allocation2 + $0x88] sm:$0xff] %v3574_v0  ;;  %v3161_v19 = vld [vmem:[#allocation10 + $0x4] ss:$16 sps:$4 sm:$0xff]   ;;  %v3159_v20 = vld [vmem:[#allocation10] ss:$16 sps:$4 sm:$0xff]  }
  0xc6   : > { %1573 = vst [vmem:[#allocation2 + $0x90] sm:$0xff] %v3574_v0  ;;  %1574 = vst [vmem:[#allocation2 + $0x98] sm:$0xff] %v3574_v0  ;;  %v3164_v22 = vld [vmem:[#allocation10 + $0x24] ss:$16 sps:$4 sm:$0xff]   ;;  %v3162_v23 = vld [vmem:[#allocation10 + $0x20] ss:$16 sps:$4 sm:$0xff]  }
  0xc7   : > { %1575 = vst [vmem:[#allocation2 + $0xa0] sm:$0xff] %v3574_v0  ;;  %1576 = vst [vmem:[#allocation2 + $0xa8] sm:$0xff] %v3574_v0  ;;  %611 = vmatpush1.bf16.msra.mxu0 %v3143_v8  ;;  %v3167_v24 = vld [vmem:[#allocation10 + $0x44] ss:$16 sps:$4 sm:$0xff]   ;;  %v3165_v25 = vld [vmem:[#allocation10 + $0x40] ss:$16 sps:$4 sm:$0xff]  }
  0xc8   : > { %1577 = vst [vmem:[#allocation2 + $0xb0] sm:$0xff] %v3574_v0  ;;  %1578 = vst [vmem:[#allocation2 + $0xb8] sm:$0xff] %v3574_v0  ;;  %612 = vmatprep.subr.bf16.mxu0 %v3144_v9  ;;  %v3170_v26 = vld [vmem:[#allocation10 + $0x64] ss:$16 sps:$4 sm:$0xff]   ;;  %v3168_v27 = vld [vmem:[#allocation10 + $0x60] ss:$16 sps:$4 sm:$0xff]  }
  0xc9   : > { %1579 = vst [vmem:[#allocation2 + $0xc0] sm:$0xff] %v3574_v0  ;;  %1580 = vst [vmem:[#allocation2 + $0xc8] sm:$0xff] %v3574_v0  ;;  %v3173_v28 = vld [vmem:[#allocation10 + $0x84] ss:$16 sps:$4 sm:$0xff]   ;;  %v3171_v29 = vld [vmem:[#allocation10 + $0x80] ss:$16 sps:$4 sm:$0xff]  }
  0xca   : > { %1581 = vst [vmem:[#allocation2 + $0xd0] sm:$0xff] %v3574_v0  ;;  %1582 = vst [vmem:[#allocation2 + $0xd8] sm:$0xff] %v3574_v0  ;;  %v3176_v30 = vld [vmem:[#allocation10 + $0xa4] ss:$16 sps:$4 sm:$0xff]   ;;  %v3174_v31 = vld [vmem:[#allocation10 + $0xa0] ss:$16 sps:$4 sm:$0xff]  }
  0xcb   : > { %1583 = vst [vmem:[#allocation2 + $0xe0] sm:$0xff] %v3574_v0  ;;  %1584 = vst [vmem:[#allocation2 + $0xe8] sm:$0xff] %v3574_v0  ;;  %613 = vmatpush1.bf16.msra.mxu0 %v3146_v10  ;;  %v3179_v32 = vld [vmem:[#allocation10 + $0xc4] ss:$16 sps:$4 sm:$0xff]   ;;  %v3177_v33 = vld [vmem:[#allocation10 + $0xc0] ss:$16 sps:$4 sm:$0xff]  }
  0xcc   : > { %1585 = vst [vmem:[#allocation2 + $0xf0] sm:$0xff] %v3574_v0  ;;  %1586 = vst [vmem:[#allocation2 + $0xf8] sm:$0xff] %v3574_v0  ;;  %614 = vmatprep.subr.bf16.mxu0 %v3147_v11  ;;  %v3182_v34 = vld [vmem:[#allocation10 + $0xe4] ss:$16 sps:$4 sm:$0xff]   ;;  %v3180_v35 = vld [vmem:[#allocation10 + $0xe0] ss:$16 sps:$4 sm:$0xff]  }
  0xcd   : > { %1587 = vst [vmem:[#allocation3] sm:$0xff] %v3574_v0  ;;  %1591 = vst [vmem:[#allocation3 + $0x20] sm:$0xff] %v3574_v0  ;;  %v3183_v36 = vld [vmem:[#allocation9] sm:$0xff]   ;;  %v3205_v44 = vld [vmem:[#allocation7 + $0xc] ss:$16 sps:$4 sm:$0xff]   ;;  %vm1647_vm1 = vcmask 1048064  }
  0xce   : > { %1596 = vst [vmem:[#allocation3 + $0x48] sm:$0xff] %v3574_v0  ;;  %1600 = vst [vmem:[#allocation3 + $0x68] sm:$0xff] %v3574_v0  ;;  %v3207_v45 = vld [vmem:[#allocation7 + $0x8] ss:$16 sps:$4 sm:$0xff]   ;;  %649 = vmatprep.subr.bf16.mxu1 %v3205_v44  ;;  %v3210_v49 = vld [vmem:[#allocation7 + $0x2c] ss:$16 sps:$4 sm:$0xff]  }
  0xcf   : > { %1605 = vst [vmem:[#allocation3 + $0x90] sm:$0xff] %v3574_v0  ;;  %1609 = vst [vmem:[#allocation3 + $0xb0] sm:$0xff] %v3574_v0  ;;  %615 = vmatpush1.bf16.msra.mxu0 %v3149_v12  ;;  %650 = vmatpush1.bf16.msra.mxu1 %v3207_v45  ;;  %v3212_v50 = vld [vmem:[#allocation7 + $0x28] ss:$16 sps:$4 sm:$0xff]   ;;  %v3213_v51 = vld [vmem:[#allocation7 + $0x4c] ss:$16 sps:$4 sm:$0xff]  }
  0xd0   : > { %1614 = vst [vmem:[#allocation3 + $0xd8] sm:$0xff] %v3574_v0  ;;  %1618 = vst [vmem:[#allocation3 + $0xf8] sm:$0xff] %v3574_v0  ;;  %616 = vmatprep.subr.bf16.mxu0 %v3150_v13  ;;  %651 = vmatprep.subr.bf16.mxu1 %v3210_v49  ;;  %v3215_v54 = vld [vmem:[#allocation7 + $0x48] ss:$16 sps:$4 sm:$0xff]   ;;  %v3218_v56 = vld [vmem:[#allocation7 + $0x6c] ss:$16 sps:$4 sm:$0xff]  }
  0xd1   : > { %v3220_v57 = vld [vmem:[#allocation7 + $0x68] ss:$16 sps:$4 sm:$0xff]   ;;  %v3221_v58 = vld [vmem:[#allocation7 + $0x8c] ss:$16 sps:$4 sm:$0xff]   ;;  %vm1619_vm2 = vcmask 130048   ;;  %s3575_s8 = smov 32  }
  0xd2   : > { %v3223_v61 = vld [vmem:[#allocation7 + $0x88] ss:$16 sps:$4 sm:$0xff]   ;;  %v3226_v63 = vld [vmem:[#allocation7 + $0xac] ss:$16 sps:$4 sm:$0xff]   ;;  %s3576_s29 = smov 16   ;;  %s3577_s17 = smov 48  }
  0xd3   : > { %617 = vmatpush1.bf16.msra.mxu0 %v3152_v14  ;;  %652 = vmatpush1.bf16.msra.mxu1 %v3212_v50  ;;  %v3228_v1 = vld [vmem:[#allocation7 + $0xa8] ss:$16 sps:$4 sm:$0xff]   ;;  %v3229_v2 = vld [vmem:[#allocation7 + $0xcc] ss:$16 sps:$4 sm:$0xff]   ;;  %s3578_s20 = smov 64   ;;  %s3579_s9 = smov 80  }
  0xd4   : > { %618 = vmatprep.subr.bf16.mxu0 %v3153_v15  ;;  %653 = vmatprep.subr.bf16.mxu1 %v3213_v51  ;;  %v3231_v5 = vld [vmem:[#allocation7 + $0xc8] ss:$16 sps:$4 sm:$0xff]   ;;  %v3234_v7 = vld [vmem:[#allocation7 + $0xec] ss:$16 sps:$4 sm:$0xff]   ;;  %s3580_s10 = smov 96   ;;  %s3581_s16 = smov 112  }
  0xd5   : > { %v3236_v8 = vld [vmem:[#allocation7 + $0xe8] ss:$16 sps:$4 sm:$0xff]   ;;  %v3239_v10 = vld [vmem:[#allocation10 + $0xc] ss:$16 sps:$4 sm:$0xff]   ;;  %vm1665_vm3 = vcmask 392448   ;;  %vm1642_vm4 = vcmask 261248  }
  0xd6   : > { %v3237_v12 = vld [vmem:[#allocation10 + $0x8] ss:$16 sps:$4 sm:$0xff]   ;;  %v3242_v13 = vld [vmem:[#allocation10 + $0x2c] ss:$16 sps:$4 sm:$0xff]   ;;  %vm1687_vm5 = vcmask 523648   ;;  %vm1709_vm6 = vcmask 654848  }
  0xd7   : > { %619 = vmatpush1.bf16.msra.mxu0 %v3155_v16  ;;  %654 = vmatpush1.bf16.msra.mxu1 %v3215_v54  ;;  %v3240_v15 = vld [vmem:[#allocation10 + $0x28] ss:$16 sps:$4 sm:$0xff]   ;;  %v3247_v16 = vld [vmem:[#allocation10 + $0x4c] ss:$16 sps:$4 sm:$0xff]   ;;  %v3203_v54 = vld [vmem:[#allocation9 + $0xa0] sm:$0xff]   ;;  %vm1731_vm7 = vcmask 786048  }
  0xd8   : > { %620 = vmatprep.subr.bf16.mxu0 %v3156_v17  ;;  %655 = vmatprep.subr.bf16.mxu1 %v3218_v56  ;;  %v3200_v51 = vld [vmem:[#allocation9 + $0x88] sm:$0xff]   ;;  %v3208_v56 = vld [vmem:[#allocation9 + $0xb0] sm:$0xff]   ;;  %vm1753_vm8 = vcmask 917248   ;;  %vm1775_vm9 = vcmask 1048448   ;;  %vm3583_vm10 = vmmov 0   ;;  %s369_s11 = scalar_lea.vmem [#allocation15], %s2632_s12 }
  0xd9   : > { %s2499_s1 = sshll.u32 %s369_s11, 4  ;;  %s2782_s15 = sshll.u32 %s3648_s30, 8  ;;  %s4032_s1 = int_to_ptr.vmem [resolvable:$true] %s2499_s1 }
  0xda   : > { %s2486_s12 = scalar_lea.sflag [#allocation6], %s3867_s22  ;;  %p4109_p4 = scmp.ne.s32.totalorder %s4099_s23, 0 }
  0xdb   : > { %621 = vmatpush1.bf16.msra.mxu0 %v3158_v18  ;;  %656 = vmatpush1.bf16.msra.mxu1 %v3220_v57  ;;  %s3584_s30 = smov [#allocation15]  }
  0xdc   : > { %884 = vmatprep.subr.bf16.mxu0 %v3161_v19  ;;  %657 = vmatprep.subr.bf16.mxu1 %v3221_v58  ;;  %v3245_v19 = vld [vmem:[#allocation10 + $0x48] ss:$16 sps:$4 sm:$0xff]  }
  0xde   : > { %639 = vmatmul.mubr.bf16.vlgmr.msra.gmra.mrb[0].mxu0 %v3935_v21 }
  0xdf   : > { %885 = vmatpush1.bf16.msra.mxu0 %v3159_v20  ;;  %916 = vmatprep.mubr.bf16.mxu0 %v3574_v0  ;;  %v3184_v20 = vld [vmem:[#allocation9 + $0x8] sm:$0xff]  }
  0xe0   : > { %886 = vmatprep.subr.bf16.mxu0 %v3164_v22  ;;  %658 = vmatpush1.bf16.msra.mxu1 %v3223_v61  ;;  %v3250_v22 = vld [vmem:[#allocation10 + $0x6c] ss:$16 sps:$4 sm:$0xff]   ;;  %v3216_v61 = vld [vmem:[#allocation9 + $0xc0] sm:$0xff]  }
  0xe1   : > { %659 = vmatprep.subr.bf16.mxu1 %v3226_v63 }
  0xe3   : > { %887 = vmatpush1.bf16.msra.mxu0 %v3162_v23  ;;  %v3185_v23 = vld [vmem:[#allocation9 + $0x10] sm:$0xff]  }
  0xe4   : > { %888 = vmatprep.subr.bf16.mxu0 %v3167_v24  ;;  %660 = vmatpush1.bf16.msra.mxu1 %v3228_v1  ;;  %v3248_v24 = vld [vmem:[#allocation10 + $0x68] ss:$16 sps:$4 sm:$0xff]  }
  0xe5   : > { %661 = vmatprep.subr.bf16.mxu1 %v3229_v2  ;;  %v3217_v2 = vld [vmem:[#allocation9 + $0xc8] sm:$0xff]  }
  0xe7   : > { %889 = vmatpush1.bf16.msra.mxu0 %v3165_v25  ;;  %v3253_v25 = vld [vmem:[#allocation10 + $0x8c] ss:$16 sps:$4 sm:$0xff]  }
  0xe8   : > { %890 = vmatprep.subr.bf16.mxu0 %v3170_v26  ;;  %662 = vmatpush1.bf16.msra.mxu1 %v3231_v5  ;;  %v3251_v26 = vld [vmem:[#allocation10 + $0x88] ss:$16 sps:$4 sm:$0xff]   ;;  %v3232_v5 = vld [vmem:[#allocation9 + $0xe0] sm:$0xff]  }
  0xe9   : > { %663 = vmatprep.subr.bf16.mxu1 %v3234_v7  ;;  %v3243_v7 = vld [vmem:[#allocation9 + $0xf0] sm:$0xff]  }
  0xeb   : > { %891 = vmatpush1.bf16.msra.mxu0 %v3168_v27  ;;  %v3186_v27 = vld [vmem:[#allocation9 + $0x18] sm:$0xff]  }
  0xec   : > { %892 = vmatprep.subr.bf16.mxu0 %v3173_v28  ;;  %664 = vmatpush1.bf16.msra.mxu1 %v3236_v8  ;;  %v3256_v28 = vld [vmem:[#allocation10 + $0xac] ss:$16 sps:$4 sm:$0xff]  }
  0xed   : > { %927 = vmatprep.subr.bf16.mxu1 %v3239_v10  ;;  %v3244_v8 = vld [vmem:[#allocation9 + $0xf8] sm:$0xff]  }
  0xef   : > { %893 = vmatpush1.bf16.msra.mxu0 %v3171_v29  ;;  %682 = vmatmul.mubr.bf16.vlgmr.msra.gmra.mrb[0].mxu1 %v3935_v21  ;;  %v3187_v29 = vld [vmem:[#allocation9 + $0x20] sm:$0xff]  }
  0xf0   : > { %894 = vmatprep.subr.bf16.mxu0 %v3176_v30  ;;  %928 = vmatpush1.bf16.msra.mxu1 %v3237_v12  ;;  %v3254_v30 = vld [vmem:[#allocation10 + $0xa8] ss:$16 sps:$4 sm:$0xff]  }
  0xf1   : > { %959 = vmatprep.mubr.bf16.mxu1 %v3574_v0  ;;  %929 = vmatprep.subr.bf16.mxu1 %v3242_v13 }
  0xf3   : > { %895 = vmatpush1.bf16.msra.mxu0 %v3174_v31  ;;  %v3259_v31 = vld [vmem:[#allocation10 + $0xcc] ss:$16 sps:$4 sm:$0xff]  }
  0xf4   : > { %896 = vmatprep.subr.bf16.mxu0 %v3179_v32  ;;  %930 = vmatpush1.bf16.msra.mxu1 %v3240_v15  ;;  %v3257_v32 = vld [vmem:[#allocation10 + $0xc8] ss:$16 sps:$4 sm:$0xff]  }
  0xf5   : > { %931 = vmatprep.subr.bf16.mxu1 %v3247_v16 }
  0xf7   : > { %897 = vmatpush1.bf16.msra.mxu0 %v3177_v33  ;;  %v3188_v33 = vld [vmem:[#allocation9 + $0x28] sm:$0xff]  }
  0xf8   : > { %898 = vmatprep.subr.bf16.mxu0 %v3182_v34  ;;  %932 = vmatpush1.bf16.msra.mxu1 %v3245_v19  ;;  %v3262_v34 = vld [vmem:[#allocation10 + $0xec] ss:$16 sps:$4 sm:$0xff]  }
  0xf9   : > { %933 = vmatprep.subr.bf16.mxu1 %v3250_v22 }
  0xfb   : > { %899 = vmatpush1.bf16.msra.mxu0 %v3180_v35  ;;  %v3189_v35 = vld [vmem:[#allocation9 + $0x30] sm:$0xff]  }
  0xfc   : > { %934 = vmatpush1.bf16.msra.mxu1 %v3248_v24 }
  0xfd   : > { %935 = vmatprep.subr.bf16.mxu1 %v3253_v25 }
  0xfe   : > { %917 = vmatmul.mubr.bf16.vlgmr.msra.gmra.mrb[4].mxu0 %v3935_v21 }
  0xff   : > { %2936 = vmatprep.mubr.bf16.mxu0 %v3183_v36  ;;  %v3260_v36 = vld [vmem:[#allocation10 + $0xe8] ss:$16 sps:$4 sm:$0xff]  }
 0x100   : > { %936 = vmatpush1.bf16.msra.mxu1 %v3251_v26 }
 0x101   : > { %937 = vmatprep.subr.bf16.mxu1 %v3256_v28 }
 0x104   : > { %938 = vmatpush1.bf16.msra.mxu1 %v3254_v30 }
 0x105   : > { %939 = vmatprep.subr.bf16.mxu1 %v3259_v31 }
 0x108   : > { %940 = vmatpush1.bf16.msra.mxu1 %v3257_v32 }
 0x109   : > { %941 = vmatprep.subr.bf16.mxu1 %v3262_v34 }
 0x10c   : > { %942 = vmatpush1.bf16.msra.mxu1 %v3260_v36 }
 0x10f   : > { %960 = vmatmul.mubr.bf16.vlgmr.msra.gmra.mrb[4].mxu1 %v3935_v21  ;;  %v3199_v21 = vld [vmem:[#allocation9 + $0x80] sm:$0xff]  }
 0x13e   : > { %v390_v37 = vpop.trf.xlu0 }
 0x142   : > { %v391_v38 = vpop.trf.xlu0 }
 0x143   : > { %v406_v39 = vpack.c.bf16 %v391_v38, %v390_v37  ;;  %v3190_v37 = vld [vmem:[#allocation9 + $0x38] sm:$0xff]   ;;  %v3191_v38 = vld [vmem:[#allocation9 + $0x40] sm:$0xff]  }
 0x145   : > { %2920 = vmatprep.subr.bf16.mxu0 %v406_v39 }
 0x146   : > { %v392_v40 = vpop.trf.xlu0  ;;  %2921 = vmatpush3.bf16.msra.mxu0 %v406_v39  ;;  %v3192_v39 = vld [vmem:[#allocation9 + $0x48] sm:$0xff]  }
 0x14a   : > { %v393_v41 = vpop.trf.xlu0 }
 0x14b   : > { %v407_v42 = vpack.c.bf16 %v393_v41, %v392_v40  ;;  %v3193_v40 = vld [vmem:[#allocation9 + $0x50] sm:$0xff]   ;;  %v3194_v41 = vld [vmem:[#allocation9 + $0x58] sm:$0xff]  }
 0x14d   : > { %2922 = vmatprep.subr.bf16.mxu0 %v407_v42 }
 0x14e   : > { %v394_v43 = vpop.trf.xlu0  ;;  %2923 = vmatpush3.bf16.msra.mxu0 %v407_v42  ;;  %v3195_v42 = vld [vmem:[#allocation9 + $0x60] sm:$0xff]  }
 0x152   : > { %v395_v46 = vpop.trf.xlu0 }
 0x153   : > { %v408_v47 = vpack.c.bf16 %v395_v46, %v394_v43  ;;  %v3197_v43 = vld [vmem:[#allocation9 + $0x70] sm:$0xff]   ;;  %v3198_v46 = vld [vmem:[#allocation9 + $0x78] sm:$0xff]  }
 0x155   : > { %2924 = vmatprep.subr.bf16.mxu0 %v408_v47 }
 0x156   : > { %v396_v48 = vpop.trf.xlu0  ;;  %2925 = vmatpush3.bf16.msra.mxu0 %v408_v47 }
 0x15a   : > { %v397_v52 = vpop.trf.xlu0 }
 0x15b   : > { %v409_v53 = vpack.c.bf16 %v397_v52, %v396_v48  ;;  %v3201_v52 = vld [vmem:[#allocation9 + $0x90] sm:$0xff]  }
 0x15d   : > { %2926 = vmatprep.subr.bf16.mxu0 %v409_v53 }
 0x15e   : > { %v398_v55 = vpop.trf.xlu0  ;;  %2927 = vmatpush3.bf16.msra.mxu0 %v409_v53  ;;  %v3202_v53 = vld [vmem:[#allocation9 + $0x98] sm:$0xff]  }
 0x162   : > { %v399_v59 = vpop.trf.xlu0 }
 0x163   : > { %v410_v60 = vpack.c.bf16 %v399_v59, %v398_v55  ;;  %v3204_v55 = vld [vmem:[#allocation9 + $0xa8] sm:$0xff]   ;;  %v3209_v59 = vld [vmem:[#allocation9 + $0xb8] sm:$0xff]  }
 0x165   : > { %2928 = vmatprep.subr.bf16.mxu0 %v410_v60 }
 0x166   : > { %v400_v62 = vpop.trf.xlu0  ;;  %2929 = vmatpush3.bf16.msra.mxu0 %v410_v60 }
 0x16a   : > { %v401_v3 = vpop.trf.xlu0 }
 0x16b   : > { %v411_v4 = vpack.c.bf16 %v401_v3, %v400_v62  ;;  %v3224_v3 = vld [vmem:[#allocation9 + $0xd0] sm:$0xff]  }
 0x16d   : > { %2930 = vmatprep.subr.bf16.mxu0 %v411_v4 }
 0x16e   : > { %v402_v6 = vpop.trf.xlu0  ;;  %2931 = vmatpush3.bf16.msra.mxu0 %v411_v4  ;;  %v3225_v4 = vld [vmem:[#allocation9 + $0xd8] sm:$0xff]  }
 0x172   : > { %v403_v9 = vpop.trf.xlu0 }
 0x173   : > { %v412_v11 = vpack.c.bf16 %v403_v9, %v402_v6  ;;  %v3233_v6 = vld [vmem:[#allocation9 + $0xe8] sm:$0xff]   ;;  %v3962_v9 = vld [vmem:[#allocation2] sm:$0xff] }
 0x175   : > { %2932 = vmatprep.subr.bf16.mxu0 %v412_v11 }
 0x176   : > { %v404_v14 = vpop.trf.xlu0  ;;  %2933 = vmatpush3.bf16.msra.mxu0 %v412_v11 }
 0x17a   : > { %v405_v17 = vpop.trf.xlu0 }
 0x17b   : > { %v413_v18 = vpack.c.bf16 %v405_v17, %v404_v14 }
 0x17d   : > { %2934 = vmatprep.subr.bf16.mxu0 %v413_v18 }
 0x17e   : > { %2935 = vmatpush3.bf16.msra.mxu0 %v413_v18 }
 0x17f   : > { %2091 = vmatprep.subr.bf16.mxu0 %v3574_v0 }
 0x181   : > { %2937 = vmatmul.mubr.bf16.vlgmr.msra.gmra.mrb[8].mxu0 %v3184_v20 }
 0x182   : > { %2940 = vmatprep.mubr.bf16.mxu0 %v3185_v23  ;;  %2092 = vmatpush1.bf16.msra.mxu0 %v3574_v0 }
 0x183   : > { %2093 = vmatprep.subr.bf16.mxu0 %v3574_v0 }
 0x186   : > { %2094 = vmatpush1.bf16.msra.mxu0 %v3574_v0 }
 0x187   : > { %2095 = vmatprep.subr.bf16.mxu0 %v3574_v0 }
 0x189   : > { %2941 = vmatmul.mubr.bf16.gmra.mrb[12].mxu0 %v3186_v27 }
 0x18a   : > { %2944 = vmatprep.mubr.bf16.mxu0 %v3187_v29  ;;  %2096 = vmatpush1.bf16.msra.mxu0 %v3574_v0 }
 0x18b   : > { %2097 = vmatprep.subr.bf16.mxu0 %v3574_v0 }
 0x18e   : > { %2098 = vmatpush1.bf16.msra.mxu0 %v3574_v0 }
 0x18f   : > { %2099 = vmatprep.subr.bf16.mxu0 %v3574_v0  ;;  %v3196_v0 = vld [vmem:[#allocation9 + $0x68] sm:$0xff]  }
 0x191   : > { %2945 = vmatmul.mubr.bf16.gmra.mrb[16].mxu0 %v3188_v33 }
 0x192   : > { %2948 = vmatprep.mubr.bf16.mxu0 %v3189_v35 }
 0x199   : > { %2949 = vmatmul.mubr.bf16.gmra.mrb[20].mxu0 %v3190_v37 }
 0x19a   : > { %2952 = vmatprep.mubr.bf16.mxu0 %v3191_v38 }
 0x1a1   : > { %2953 = vmatmul.mubr.bf16.gmra.mrb[24].mxu0 %v3192_v39 }
 0x1a2   : > { %2956 = vmatprep.mubr.bf16.mxu0 %v3193_v40 }
 0x1a9   : > { %2957 = vmatmul.mubr.bf16.gmra.mrb[28].mxu0 %v3194_v41 }
 0x1aa   : > { %2960 = vmatprep.mubr.bf16.mxu0 %v3195_v42 }
 0x1b1   : > { %2961 = vmatmul.mubr.bf16.gmra.mrb[32].mxu0 %v3196_v0  ;;  %v3952_v44 = vpop.f32.mrb[0].mxu0 }
 0x1b2   : > { %2964 = vmatprep.mubr.bf16.mxu0 %v3197_v43  ;;  %v642_v45 = vpop.f32.mrb[1].mxu0 }
 0x1b3   : > { %v3954_v47 = vpop.f32.mrb[2].mxu0 }
 0x1b4   : > { %v1515_v48 = vpack.c.bf16 %v3954_v47, %v3952_v44  ;;  %v646_v49 = vpop.f32.mrb[3].mxu0 }
 0x1b5   : > { %v1516_v50 = vpack.c.bf16 %v646_v49, %v642_v45 }
 0x1b7   : > { %1845 = vmatprep.mubr.bf16.mxu1 %v1516_v50 }
 0x1b9   : > { %2965 = vmatmul.mubr.bf16.gmra.mrb[36].mxu0 %v3198_v46 }
 0x1ba   : > { %2968 = vmatprep.mubr.bf16.mxu0 %v3199_v21 }
 0x1c1   : > { %2969 = vmatmul.mubr.bf16.gmra.mrb[40].mxu0 %v3200_v51 }
 0x1c2   : > { %2972 = vmatprep.mubr.bf16.mxu0 %v3201_v52 }
 0x1c9   : > { %2973 = vmatmul.mubr.bf16.gmra.mrb[44].mxu0 %v3202_v53 }
 0x1ca   : > { %2976 = vmatprep.mubr.bf16.mxu0 %v3203_v54 }
 0x1d1   : > { %2977 = vmatmul.mubr.bf16.gmra.mrb[48].mxu0 %v3204_v55  ;;  %v918_v57 = vpop.f32.mrb[4].mxu0 }
 0x1d2   : > { %2980 = vmatprep.mubr.bf16.mxu0 %v3208_v56  ;;  %v920_v58 = vpop.f32.mrb[5].mxu0 }
 0x1d3   : > { %v922_v60 = vpop.f32.mrb[6].mxu0 }
 0x1d4   : > { %v1519_v62 = vpack.c.bf16 %v922_v60, %v918_v57  ;;  %v924_v63 = vpop.f32.mrb[7].mxu0 }
 0x1d5   : > { %v1520_v1 = vpack.c.bf16 %v924_v63, %v920_v58 }
 0x1d6   : > { %1625 = vst.msk [vmem:[#allocation3] sm:$0xff] %vm1624_vm0, %v1519_v62 }
 0x1d7   : > { %1648 = vst.msk [vmem:[#allocation3 + $0x20] sm:$0xff] %vm1647_vm1, %v1519_v62  ;;  %1692 = vst.msk [vmem:[#allocation3 + $0x68] sm:$0xff] %vm1647_vm1, %v1520_v1 }
 0x1d8   : > { %1670 = vst.msk [vmem:[#allocation3 + $0x48] sm:$0xff] %vm1624_vm0, %v1520_v1 }
 0x1d9   : > { %2981 = vmatmul.mubr.bf16.gmra.mrb[52].mxu0 %v3209_v59 }
 0x1da   : > { %2984 = vmatprep.mubr.bf16.mxu0 %v3216_v61 }
 0x1e1   : > { %2985 = vmatmul.mubr.bf16.gmra.mrb[56].mxu0 %v3217_v2 }
 0x1e2   : > { %2988 = vmatprep.mubr.bf16.mxu0 %v3224_v3 }
 0x1e9   : > { %2989 = vmatmul.mubr.bf16.gmra.mrb[60].mxu0 %v3225_v4 }
 0x1ea   : > { %2992 = vmatprep.mubr.bf16.mxu0 %v3232_v5 }
 0x1f1   : > { %2993 = vmatmul.mubr.bf16.gmra.mrb[64].mxu0 %v3233_v6 }
 0x1f2   : > { %2996 = vmatprep.mubr.bf16.mxu0 %v3243_v7 }
 0x1f9   : > { %2997 = vmatmul.mubr.bf16.gmra.mrb[68].mxu0 %v3244_v8 }
 0x1fa   : > { %2123 = vmatprep.mubr.bf16.mxu0 %v3962_v9 }
 0x254   : > { %v2938_v10 = vpop.f32.mrb[8].mxu0 }
 0x255   : > { %v1260_v11 = vpop.f32.mrb[9].mxu0 }
 0x256   : > { %v2939_v12 = vpop.f32.mrb[10].mxu0 }
 0x257   : > { %v1524_v13 = vpack.c.bf16 %v2939_v12, %v2938_v10  ;;  %v1263_v14 = vpop.f32.mrb[11].mxu0 }
 0x258   : > { %v1523_v15 = vpack.c.bf16 %v1263_v14, %v1260_v11 }
 0x259   : > { %1621 = vst.msk [vmem:[#allocation2 + $0x8] sm:$0xff] %vm1619_vm2, %v1524_v13 }
 0x25a   : > { %1620 = vst.msk [vmem:[#allocation2] sm:$0xff] %vm1619_vm2, %v1523_v15 }
 0x25c   : > { %v2942_v16 = vpop.f32.mrb[12].mxu0 }
 0x25d   : > { %v1276_v17 = vpop.f32.mrb[13].mxu0 }
 0x25e   : > { %v2943_v18 = vpop.f32.mrb[14].mxu0 }
 0x25f   : > { %v1526_v19 = vpack.c.bf16 %v2943_v18, %v2942_v16  ;;  %v1279_v20 = vpop.f32.mrb[15].mxu0 }
 0x260   : > { %v1525_v22 = vpack.c.bf16 %v1279_v20, %v1276_v17 }
 0x261   : > { %1623 = vst.msk [vmem:[#allocation2 + $0x18] sm:$0xff] %vm1619_vm2, %v1526_v19 }
 0x262   : > { %1622 = vst.msk [vmem:[#allocation2 + $0x10] sm:$0xff] %vm1619_vm2, %v1525_v22 }
 0x264   : > { %v2946_v23 = vpop.f32.mrb[16].mxu0 }
 0x265   : > { %v1292_v24 = vpop.f32.mrb[17].mxu0 }
 0x266   : > { %v2947_v25 = vpop.f32.mrb[18].mxu0 }
 0x267   : > { %v1528_v26 = vpack.c.bf16 %v2947_v25, %v2946_v23  ;;  %v1295_v27 = vpop.f32.mrb[19].mxu0 }
 0x268   : > { %v1527_v28 = vpack.c.bf16 %v1295_v27, %v1292_v24 }
 0x26c   : > { %v2950_v29 = vpop.f32.mrb[20].mxu0 }
 0x26d   : > { %v1308_v30 = vpop.f32.mrb[21].mxu0 }
 0x26e   : > { %v2951_v31 = vpop.f32.mrb[22].mxu0 }
 0x26f   : > { %v1530_v32 = vpack.c.bf16 %v2951_v31, %v2950_v29  ;;  %v1311_v33 = vpop.f32.mrb[23].mxu0 }
 0x270   : > { %v1529_v34 = vpack.c.bf16 %v1311_v33, %v1308_v30 }
 0x274   : > { %v2954_v35 = vpop.f32.mrb[24].mxu0 }
 0x275   : > { %v1324_v36 = vpop.f32.mrb[25].mxu0 }
 0x276   : > { %v2955_v37 = vpop.f32.mrb[26].mxu0 }
 0x277   : > { %v1532_v38 = vpack.c.bf16 %v2955_v37, %v2954_v35  ;;  %v1327_v39 = vpop.f32.mrb[27].mxu0 }
 0x278   : > { %v1531_v40 = vpack.c.bf16 %v1327_v39, %v1324_v36 }
 0x279   : > { %1655 = vrot.lane.b32.xlu1 %v1532_v38, %s3575_s8 }
 0x27c   : > { %v2958_v41 = vpop.f32.mrb[28].mxu0 }
 0x27d   : > { %1653 = vrot.lane.b32.xlu1 %v1531_v40, %s3575_s8  ;;  %v1340_v42 = vpop.f32.mrb[29].mxu0 }
 0x27e   : > { %v2959_v0 = vpop.f32.mrb[30].mxu0 }
 0x27f   : > { %v1534_v43 = vpack.c.bf16 %v2959_v0, %v2958_v41  ;;  %v1343_v45 = vpop.f32.mrb[31].mxu0 }
 0x280   : > { %v1533_v46 = vpack.c.bf16 %v1343_v45, %v1340_v42 }
 0x281   : > { %1659 = vrot.lane.b32.xlu1 %v1534_v43, %s3575_s8 }
 0x282   : > { %1657 = vrot.lane.b32.xlu0 %v1533_v46, %s3575_s8 }
 0x284   : > { %v2962_v21 = vpop.f32.mrb[32].mxu0 }
 0x285   : > { %1630 = vrot.lane.b32.xlu1 %v1527_v28, %s3576_s29  ;;  %v1356_v49 = vpop.f32.mrb[33].mxu0 }
 0x286   : > { %v2963_v50 = vpop.f32.mrb[34].mxu0 }
 0x287   : > { %v1536_v51 = vpack.c.bf16 %v2963_v50, %v2962_v21  ;;  %v1359_v52 = vpop.f32.mrb[35].mxu0  ;;  %v3967_v21 = vpop.f32.mrb[0].mxu1 }
 0x288   : > { %v1535_v53 = vpack.c.bf16 %v1359_v52, %v1356_v49  ;;  %v3970_v49 = vpop.f32.mrb[1].mxu1 }
 0x289   : > { %1632 = vrot.lane.b32.xlu1 %v1528_v26, %s3576_s29  ;;  %v3972_v50 = vpop.f32.mrb[2].mxu1 }
 0x28a   : > { %v3976_v52 = vpop.f32.mrb[3].mxu1 }
 0x28c   : > { %v2966_v54 = vpop.f32.mrb[36].mxu0 }
 0x28d   : > { %1634 = vrot.lane.b32.xlu1 %v1529_v34, %s3576_s29  ;;  %v1372_v55 = vpop.f32.mrb[37].mxu0 }
 0x28e   : > { %v2967_v56 = vpop.f32.mrb[38].mxu0 }
 0x28f   : > { %v1538_v57 = vpack.c.bf16 %v2967_v56, %v2966_v54  ;;  %v1375_v58 = vpop.f32.mrb[39].mxu0  ;;  %v961_v54 = vpop.f32.mrb[4].mxu1 }
 0x290   : > { %v1537_v59 = vpack.c.bf16 %v1375_v58, %v1372_v55  ;;  %v963_v55 = vpop.f32.mrb[5].mxu1 }
 0x291   : > { %1636 = vrot.lane.b32.xlu1 %v1530_v32, %s3576_s29  ;;  %v965_v56 = vpop.f32.mrb[6].mxu1  ;;  %s4037_s29 = scalar_lea.hbm %s4088_s7, %s2782_s15 }
 0x292   : > { %v967_v58 = vpop.f32.mrb[7].mxu1 }
 0x294   : > { %v2970_v60 = vpop.f32.mrb[40].mxu0 }
 0x295   : > { %1677 = vrot.lane.b32.xlu1 %v1536_v51, %s3577_s17  ;;  %v1388_v61 = vpop.f32.mrb[41].mxu0  ;;  %v1517_v51 = vpack.c.bf16 %v3972_v50, %v3967_v21  ;;  %v3266_v21 = vld [vmem:[#allocation13 + $0x18] sm:$0xff]  }
 0x296   : > { %v2971_v62 = vpop.f32.mrb[42].mxu0 }
 0x297   : > { %v1540_v63 = vpack.c.bf16 %v2971_v62, %v2970_v60  ;;  %v1391_v1 = vpop.f32.mrb[43].mxu0 }
 0x298   : > { %v1539_v2 = vpack.c.bf16 %v1391_v1, %v1388_v61 }
 0x299   : > { %1675 = vrot.lane.b32.xlu1 %v1535_v53, %s3577_s17  ;;  %v1518_v53 = vpack.c.bf16 %v3976_v52, %v3970_v49 }
 0x29c   : > { %v2974_v3 = vpop.f32.mrb[44].mxu0 }
 0x29d   : > { %1681 = vrot.lane.b32.xlu1 %v1538_v57, %s3577_s17  ;;  %v1404_v4 = vpop.f32.mrb[45].mxu0  ;;  %v1521_v57 = vpack.c.bf16 %v965_v56, %v961_v54 }
 0x29e   : > { %v2975_v5 = vpop.f32.mrb[46].mxu0 }
 0x29f   : > { %v1542_v6 = vpack.c.bf16 %v2975_v5, %v2974_v3  ;;  %v1407_v7 = vpop.f32.mrb[47].mxu0  ;;  %1714 = vst.msk [vmem:[#allocation3 + $0x90] sm:$0xff] %vm1624_vm0, %v1521_v57 }
 0x2a0   : > { %v1541_v8 = vpack.c.bf16 %v1407_v7, %v1404_v4  ;;  %1736 = vst.msk [vmem:[#allocation3 + $0xb0] sm:$0xff] %vm1647_vm1, %v1521_v57  ;;  %v1781_v4 = vld [vmem:[#allocation2] sm:$0xff]  ;;  %v1782_v7 = vld [vmem:[#allocation2 + $0x8] sm:$0xff] }
 0x2a1   : > { %1679 = vrot.lane.b32.xlu1 %v1537_v59, %s3577_s17  ;;  %v1522_v59 = vpack.c.bf16 %v967_v58, %v963_v55  ;;  %s3482_s17 = scalar_lea.vmem %s4032_s1, 256 }
 0x2a2   : > { %p3483_p7 = scmp.ne.s32.totalorder %s4032_s1, %s3482_s17 }
 0x2a3   : > { %1758 = vst.msk [vmem:[#allocation3 + $0xd8] sm:$0xff] %vm1624_vm0, %v1522_v59 }
 0x2a4   : > { %v2978_v10 = vpop.f32.mrb[48].mxu0  ;;  %1780 = vst.msk [vmem:[#allocation3 + $0xf8] sm:$0xff] %vm1647_vm1, %v1522_v59  ;;  %p3484_p12 = pnand %p3483_p7, %p4109_p4 }
 0x2a5   : > { %1699 = vrot.lane.b32.xlu1 %v1540_v63, %s3578_s20  ;;  %v1420_v11 = vpop.f32.mrb[49].mxu0 }
 0x2a6   : > { %v2979_v12 = vpop.f32.mrb[50].mxu0  ;;  %v2034_v61 = vld [vmem:[#allocation3 + $0x90] sm:$0xff]  ;;  %p3485_p1 = pneg %p3484_p12 }
 0x2a7   : > { %v1544_v13 = vpack.c.bf16 %v2979_v12, %v2978_v10  ;;  %v1423_v14 = vpop.f32.mrb[51].mxu0  ;;  %2100 = vmatpush1.bf16.msra.mxu0 %v2034_v61  ;;  %v2038_v61 = vld [vmem:[#allocation3 + $0xb0] sm:$0xff] }
 0x2a8   : > { %v1543_v15 = vpack.c.bf16 %v1423_v14, %v1420_v11  ;;  %2101 = vmatprep.subr.bf16.mxu0 %v3962_v9  ;;  %v1783_v11 = vld [vmem:[#allocation2 + $0x10] sm:$0xff]  ;;  %v1784_v14 = vld [vmem:[#allocation2 + $0x18] sm:$0xff] }
 0x2a9   : > { %1697 = vrot.lane.b32.xlu1 %v1539_v2, %s3578_s20 }
 0x2ab   : > { %2102 = vmatpush1.bf16.msra.mxu0 %v2038_v61  ;;  %v3287_v61 = vld [vmem:[#allocation12 + $0x60] sm:$0xff]  }
 0x2ac   : > { %v2982_v16 = vpop.f32.mrb[52].mxu0 }
 0x2ad   : > { %1703 = vrot.lane.b32.xlu1 %v1542_v6, %s3578_s20  ;;  %v1436_v17 = vpop.f32.mrb[53].mxu0 }
 0x2ae   : > { %v2983_v18 = vpop.f32.mrb[54].mxu0 }
 0x2af   : > { %v1546_v19 = vpack.c.bf16 %v2983_v18, %v2982_v16  ;;  %v1439_v20 = vpop.f32.mrb[55].mxu0 }
 0x2b0   : > { %v1545_v22 = vpack.c.bf16 %v1439_v20, %v1436_v17 }
 0x2b1   : > { %1701 = vrot.lane.b32.xlu1 %v1541_v8, %s3578_s20  ;;  %s3486_s20 = sshll.u32 %s3584_s30, 4  ;;  %s3487_s20 = int_to_ptr.vmem [resolvable:$false] %s3486_s20 }
 0x2b2   : > { %p3489_p13 = scmp.lt.s32.totalorder %s4032_s1, %s3487_s20 }
 0x2b4   : > { %v2986_v23 = vpop.f32.mrb[56].mxu0 }
 0x2b5   : > { %1721 = vrot.lane.b32.xlu1 %v1544_v13, %s3579_s9  ;;  %v1452_v24 = vpop.f32.mrb[57].mxu0 }
 0x2b6   : > { %v2987_v25 = vpop.f32.mrb[58].mxu0 }
 0x2b7   : > { %v1548_v26 = vpack.c.bf16 %v2987_v25, %v2986_v23  ;;  %v1455_v27 = vpop.f32.mrb[59].mxu0 }
 0x2b8   : > { %v1547_v28 = vpack.c.bf16 %v1455_v27, %v1452_v24 }
 0x2b9   : > { %1719 = vrot.lane.b32.xlu1 %v1543_v15, %s3579_s9 }
 0x2bc   : > { %v2990_v29 = vpop.f32.mrb[60].mxu0 }
 0x2bd   : > { %1743 = vrot.lane.b32.xlu1 %v1548_v26, %s3580_s10  ;;  %v1468_v30 = vpop.f32.mrb[61].mxu0 }
 0x2be   : > { %v2991_v31 = vpop.f32.mrb[62].mxu0 }
 0x2bf   : > { %v1550_v32 = vpack.c.bf16 %v2991_v31, %v2990_v29  ;;  %v1471_v33 = vpop.f32.mrb[63].mxu0 }
 0x2c0   : > { %v1549_v34 = vpack.c.bf16 %v1471_v33, %v1468_v30 }
 0x2c1   : > { %1741 = vrot.lane.b32.xlu1 %v1547_v28, %s3580_s10 }
 0x2c4   : > { %v2994_v35 = vpop.f32.mrb[64].mxu0 }
 0x2c5   : > { %1747 = vrot.lane.b32.xlu1 %v1550_v32, %s3580_s10  ;;  %v1484_v36 = vpop.f32.mrb[65].mxu0 }
 0x2c6   : > { %v2995_v37 = vpop.f32.mrb[66].mxu0 }
 0x2c7   : > { %v1552_v38 = vpack.c.bf16 %v2995_v37, %v2994_v35  ;;  %v1487_v39 = vpop.f32.mrb[67].mxu0 }
 0x2c8   : > { %v1551_v40 = vpack.c.bf16 %v1487_v39, %v1484_v36 }
 0x2c9   : > { %1745 = vrot.lane.b32.xlu1 %v1549_v34, %s3580_s10 }
 0x2cc   : > { %v2998_v41 = vpop.f32.mrb[68].mxu0 }
 0x2cd   : > { %1765 = vrot.lane.b32.xlu1 %v1552_v38, %s3581_s16  ;;  %v1500_v42 = vpop.f32.mrb[69].mxu0 }
 0x2ce   : > { %v2999_v0 = vpop.f32.mrb[70].mxu0 }
 0x2cf   : > { %v1554_v43 = vpack.c.bf16 %v2999_v0, %v2998_v41  ;;  %v1503_v45 = vpop.f32.mrb[71].mxu0 }
 0x2d0   : > { %v1553_v46 = vpack.c.bf16 %v1503_v45, %v1500_v42 }
 0x2d1   : > { %1763 = vrot.lane.b32.xlu1 %v1551_v40, %s3581_s16 }
 0x2d5   : > { %1723 = vrot.lane.b32.xlu1 %v1545_v22, %s3579_s9 }
 0x2d9   : > { %1767 = vrot.lane.b32.xlu1 %v1553_v46, %s3581_s16 }
 0x2dd   : > { %1769 = vrot.lane.b32.xlu1 %v1554_v43, %s3581_s16 }
 0x2e1   : > { %1725 = vrot.lane.b32.xlu1 %v1546_v19, %s3579_s9  ;;  %s3488_s9 = scalar_lea.vmem %s3487_s20, 512 }
 0x2e2   : > { %p3490_p0 = scmp.lt.s32.totalorder %s3488_s9, %s3482_s17 }
 0x2e4   : > { %p3491_p2 = por %p3490_p0, %p3489_p13 }
 0x2e6   : > { %p3492_p8 = pnand %p3491_p2, %p3485_p1 }
 0x2eb   : > { %v1656_v60 = vpop.permute.xlu1 %1655 }
 0x2ec   : > { %1667 = vst.msk [vmem:[#allocation2 + $0x48] sm:$0xff] %vm1665_vm3, %v1656_v60 }
 0x2ef   : > { %v1654_v62 = vpop.permute.xlu1 %1653 }
 0x2f0   : > { %1666 = vst.msk [vmem:[#allocation2 + $0x40] sm:$0xff] %vm1665_vm3, %v1654_v62  ;;  %v2043_v62 = vld [vmem:[#allocation3 + $0xd8] sm:$0xff] }
 0x2f1   : > { %2103 = vmatprep.subr.bf16.mxu0 %v2043_v62  ;;  %v3288_v62 = vld [vmem:[#allocation12 + $0xe0] sm:$0xff]  }
 0x2f2   : > { %2104 = vmatpush1.bf16.msra.mxu0 %v3962_v9 }
 0x2f3   : > { %v1660_v63 = vpop.permute.xlu1 %1659  ;;  %v1790_v5 = vld [vmem:[#allocation2 + $0x48] sm:$0xff] }
 0x2f4   : > { %1669 = vst.msk [vmem:[#allocation2 + $0x58] sm:$0xff] %vm1665_vm3, %v1660_v63  ;;  %v1658_v1 = vpop.permute.xlu0 %1657  ;;  %v2047_v63 = vld [vmem:[#allocation3 + $0xf8] sm:$0xff] }
 0x2f5   : > { %1668 = vst.msk [vmem:[#allocation2 + $0x50] sm:$0xff] %vm1665_vm3, %v1658_v1  ;;  %2105 = vmatprep.subr.bf16.mxu0 %v2047_v63  ;;  %v3263_v1 = vld [vmem:[#allocation13] sm:$0xff]  }
 0x2f6   : > { %2106 = vmatpush1.bf16.msra.mxu0 %v3962_v9  ;;  %v3289_v63 = vld [vmem:[#allocation12 + $0x20] sm:$0xff]  }
 0x2f7   : > { %v1631_v2 = vpop.permute.xlu1 %1630  ;;  %v1789_v3 = vld [vmem:[#allocation2 + $0x40] sm:$0xff] }
 0x2f8   : > { %1643 = vst.msk [vmem:[#allocation2 + $0x20] sm:$0xff] %vm1642_vm4, %v1631_v2  ;;  %2823 = vmatprep.subr.bf16.mxu1 %v1789_v3  ;;  %v3582_v2 = vmov 0.0   ;;  %v3264_v3 = vld [vmem:[#allocation13 + $0x8] sm:$0xff]  }
 0x2f9   : > { %2824 = vmatpush3.bf16.msra.mxu1 %v1781_v4  ;;  %v3265_v4 = vld [vmem:[#allocation13 + $0x10] sm:$0xff]  }
 0x2fa   : > { %2825 = vmatprep.subr.bf16.mxu1 %v1790_v5 }
 0x2fb   : > { %v1633_v6 = vpop.permute.xlu1 %1632  ;;  %v1792_v12 = vld [vmem:[#allocation2 + $0x58] sm:$0xff] }
 0x2fc   : > { %1644 = vst.msk [vmem:[#allocation2 + $0x28] sm:$0xff] %vm1642_vm4, %v1633_v6  ;;  %v1791_v8 = vld [vmem:[#allocation2 + $0x50] sm:$0xff] }
 0x2fd   : > { %2826 = vmatpush3.bf16.msra.mxu1 %v1782_v7 }
 0x2fe   : > { %2827 = vmatprep.subr.bf16.mxu1 %v1791_v8 }
 0x2ff   : > { %v1635_v10 = vpop.permute.xlu1 %1634  ;;  %v1785_v20 = vld [vmem:[#allocation2 + $0x20] sm:$0xff] }
 0x300   : > { %1645 = vst.msk [vmem:[#allocation2 + $0x30] sm:$0xff] %vm1642_vm4, %v1635_v10 }
 0x301   : > { %2828 = vmatpush3.bf16.msra.mxu1 %v1783_v11 }
 0x302   : > { %2829 = vmatprep.subr.bf16.mxu1 %v1792_v12 }
 0x303   : > { %v1637_v13 = vpop.permute.xlu1 %1636  ;;  %v1786_v24 = vld [vmem:[#allocation2 + $0x28] sm:$0xff] }
 0x304   : > { %1646 = vst.msk [vmem:[#allocation2 + $0x38] sm:$0xff] %vm1642_vm4, %v1637_v13 }
 0x305   : > { %2830 = vmatpush3.bf16.msra.mxu1 %v1784_v14 }
 0x307   : > { %v1678_v15 = vpop.permute.xlu1 %1677  ;;  %v1787_v27 = vld [vmem:[#allocation2 + $0x30] sm:$0xff] }
 0x308   : > { %1689 = vst.msk [vmem:[#allocation2 + $0x68] sm:$0xff] %vm1687_vm5, %v1678_v15 }
 0x30b   : > { %v1676_v16 = vpop.permute.xlu1 %1675  ;;  %v1788_v30 = vld [vmem:[#allocation2 + $0x38] sm:$0xff] }
 0x30c   : > { %1688 = vst.msk [vmem:[#allocation2 + $0x60] sm:$0xff] %vm1687_vm5, %v1676_v16 }
 0x30f   : > { %v1682_v17 = vpop.permute.xlu1 %1681  ;;  %v1794_v22 = vld [vmem:[#allocation2 + $0x68] sm:$0xff] }
 0x310   : > { %1691 = vst.msk [vmem:[#allocation2 + $0x78] sm:$0xff] %vm1687_vm5, %v1682_v17 }
 0x313   : > { %v1680_v18 = vpop.permute.xlu1 %1679  ;;  %v1793_v19 = vld [vmem:[#allocation2 + $0x60] sm:$0xff] }
 0x314   : > { %1690 = vst.msk [vmem:[#allocation2 + $0x70] sm:$0xff] %vm1687_vm5, %v1680_v18  ;;  %2831 = vmatprep.subr.bf16.mxu1 %v1793_v19  ;;  %v3267_v18 = vld [vmem:[#allocation13 + $0x20] sm:$0xff]   ;;  %v3268_v19 = vld [vmem:[#allocation13 + $0x28] sm:$0xff]  }
 0x315   : > { %2832 = vmatpush3.bf16.msra.mxu1 %v1785_v20  ;;  %v3269_v20 = vld [vmem:[#allocation13 + $0x30] sm:$0xff]  }
 0x316   : > { %2833 = vmatprep.subr.bf16.mxu1 %v1794_v22  ;;  %v3270_v22 = vld [vmem:[#allocation13 + $0x38] sm:$0xff]  }
 0x317   : > { %v1700_v23 = vpop.permute.xlu1 %1699  ;;  %v1796_v28 = vld [vmem:[#allocation2 + $0x78] sm:$0xff] }
 0x318   : > { %1711 = vst.msk [vmem:[#allocation2 + $0x88] sm:$0xff] %vm1709_vm6, %v1700_v23 }
 0x319   : > { %2834 = vmatpush3.bf16.msra.mxu1 %v1786_v24 }
 0x31b   : > { %v1698_v25 = vpop.permute.xlu1 %1697  ;;  %v1795_v26 = vld [vmem:[#allocation2 + $0x70] sm:$0xff] }
 0x31c   : > { %1710 = vst.msk [vmem:[#allocation2 + $0x80] sm:$0xff] %vm1709_vm6, %v1698_v25  ;;  %2835 = vmatprep.subr.bf16.mxu1 %v1795_v26 }
 0x31d   : > { %2836 = vmatpush3.bf16.msra.mxu1 %v1787_v27 }
 0x31e   : > { %2837 = vmatprep.subr.bf16.mxu1 %v1796_v28 }
 0x31f   : > { %v1704_v29 = vpop.permute.xlu1 %1703  ;;  %v1798_v39 = vld [vmem:[#allocation2 + $0x88] sm:$0xff] }
 0x320   : > { %1713 = vst.msk [vmem:[#allocation2 + $0x98] sm:$0xff] %vm1709_vm6, %v1704_v29 }
 0x321   : > { %2838 = vmatpush3.bf16.msra.mxu1 %v1788_v30 }
 0x323   : > { %v1702_v31 = vpop.permute.xlu1 %1701 }
 0x324   : > { %1712 = vst.msk [vmem:[#allocation2 + $0x90] sm:$0xff] %vm1709_vm6, %v1702_v31  ;;  %1846 = vmatmul.mubr.bf16.vlgmr.msra.gmra.mrb[8].mxu1 %v1515_v48  ;;  %v1797_v48 = vld [vmem:[#allocation2 + $0x80] sm:$0xff] }
 0x325   : > { %1886 = vmatprep.mubr.bf16.mxu1 %v1518_v53 }
 0x327   : > { %v1722_v32 = vpop.permute.xlu1 %1721  ;;  %v1800_v45 = vld [vmem:[#allocation2 + $0x98] sm:$0xff] }
 0x328   : > { %1733 = vst.msk [vmem:[#allocation2 + $0xa8] sm:$0xff] %vm1731_vm7, %v1722_v32  ;;  %v2016_v32 = vld [vmem:[#allocation3] sm:$0xff] }
 0x32b   : > { %v1720_v33 = vpop.permute.xlu1 %1719  ;;  %v1799_v42 = vld [vmem:[#allocation2 + $0x90] sm:$0xff] }
 0x32c   : > { %1732 = vst.msk [vmem:[#allocation2 + $0xa0] sm:$0xff] %vm1731_vm7, %v1720_v33  ;;  %v2020_v33 = vld [vmem:[#allocation3 + $0x20] sm:$0xff] }
 0x32f   : > { %v1744_v34 = vpop.permute.xlu1 %1743  ;;  %v1802_v55 = vld [vmem:[#allocation2 + $0xa8] sm:$0xff] }
 0x330   : > { %1755 = vst.msk [vmem:[#allocation2 + $0xc8] sm:$0xff] %vm1753_vm8, %v1744_v34  ;;  %v2025_v34 = vld [vmem:[#allocation3 + $0x48] sm:$0xff] }
 0x333   : > { %v1742_v35 = vpop.permute.xlu1 %1741  ;;  %v1801_v52 = vld [vmem:[#allocation2 + $0xa0] sm:$0xff] }
 0x334   : > { %1754 = vst.msk [vmem:[#allocation2 + $0xc0] sm:$0xff] %vm1753_vm8, %v1742_v35  ;;  %v2029_v35 = vld [vmem:[#allocation3 + $0x68] sm:$0xff] }
 0x337   : > { %v1748_v36 = vpop.permute.xlu1 %1747  ;;  %v1806_v37 = vld [vmem:[#allocation2 + $0xc8] sm:$0xff] }
 0x338   : > { %1757 = vst.msk [vmem:[#allocation2 + $0xd8] sm:$0xff] %vm1753_vm8, %v1748_v36  ;;  %v3271_v36 = vld [vmem:[#allocation12 + $0x40] sm:$0xff]  }
 0x33b   : > { %v1746_v44 = vpop.permute.xlu1 %1745  ;;  %v1805_v47 = vld [vmem:[#allocation2 + $0xc0] sm:$0xff] }
 0x33c   : > { %1756 = vst.msk [vmem:[#allocation2 + $0xd0] sm:$0xff] %vm1753_vm8, %v1746_v44  ;;  %2845 = vmatprep.subr.bf16.mxu1 %v1805_v47  ;;  %v3272_v44 = vld [vmem:[#allocation12 + $0xc0] sm:$0xff]  }
 0x33d   : > { %2846 = vmatpush3.bf16.msra.mxu1 %v1797_v48  ;;  %2898 = vmatprep.subr.bf16.mxu0 %v3272_v44 }
 0x33e   : > { %2847 = vmatprep.subr.bf16.mxu1 %v1806_v37 }
 0x33f   : > { %v1766_v38 = vpop.permute.xlu1 %1765  ;;  %v1808_v0 = vld [vmem:[#allocation2 + $0xd8] sm:$0xff] }
 0x340   : > { %1777 = vst.msk [vmem:[#allocation2 + $0xe8] sm:$0xff] %vm1775_vm9, %v1766_v38 }
 0x341   : > { %2848 = vmatpush3.bf16.msra.mxu1 %v1798_v39 }
 0x343   : > { %v1764_v40 = vpop.permute.xlu1 %1763  ;;  %v1807_v41 = vld [vmem:[#allocation2 + $0xd0] sm:$0xff] }
 0x344   : > { %1776 = vst.msk [vmem:[#allocation2 + $0xe0] sm:$0xff] %vm1775_vm9, %v1764_v40  ;;  %2849 = vmatprep.subr.bf16.mxu1 %v1807_v41 }
 0x345   : > { %2850 = vmatpush3.bf16.msra.mxu1 %v1799_v42 }
 0x346   : > { %2851 = vmatprep.subr.bf16.mxu1 %v1808_v0  ;;  %v3273_v0 = vld [vmem:[#allocation12] sm:$0xff]  }
 0x347   : > { %v1724_v43 = vpop.permute.xlu1 %1723  ;;  %v1810_v53 = vld [vmem:[#allocation2 + $0xe8] sm:$0xff] }
 0x348   : > { %1734 = vst.msk [vmem:[#allocation2 + $0xb0] sm:$0xff] %vm1731_vm7, %v1724_v43  ;;  %v3274_v43 = vld [vmem:[#allocation12 + $0x80] sm:$0xff]  }
 0x349   : > { %2852 = vmatpush3.bf16.msra.mxu1 %v1800_v45 }
 0x34b   : > { %v1768_v46 = vpop.permute.xlu1 %1767  ;;  %v1809_v49 = vld [vmem:[#allocation2 + $0xe0] sm:$0xff] }
 0x34c   : > { %1778 = vst.msk [vmem:[#allocation2 + $0xf0] sm:$0xff] %vm1775_vm9, %v1768_v46  ;;  %2853 = vmatprep.subr.bf16.mxu1 %v1809_v49  ;;  %v3275_v46 = vld [vmem:[#allocation12 + $0x48] sm:$0xff]  }
 0x34d   : > { %2854 = vmatpush3.bf16.msra.mxu1 %v1801_v52  ;;  %v3276_v49 = vld [vmem:[#allocation12 + $0xc8] sm:$0xff]  }
 0x34e   : > { %2855 = vmatprep.subr.bf16.mxu1 %v1810_v53  ;;  %v3278_v52 = vld [vmem:[#allocation12 + $0x88] sm:$0xff]   ;;  %v3279_v53 = vld [vmem:[#allocation12 + $0x50] sm:$0xff]  }
 0x34f   : > { %v1770_v54 = vpop.permute.xlu1 %1769  ;;  %v1803_v58 = vld [vmem:[#allocation2 + $0xb0] sm:$0xff] }
 0x350   : > { %1779 = vst.msk [vmem:[#allocation2 + $0xf8] sm:$0xff] %vm1775_vm9, %v1770_v54  ;;  %v3280_v54 = vld [vmem:[#allocation12 + $0xd0] sm:$0xff]  }
 0x351   : > { %2856 = vmatpush3.bf16.msra.mxu1 %v1802_v55  ;;  %v3281_v55 = vld [vmem:[#allocation12 + $0x10] sm:$0xff]  }
 0x353   : > { %v1726_v56 = vpop.permute.xlu1 %1725  ;;  %v1811_v57 = vld [vmem:[#allocation2 + $0xf0] sm:$0xff] }
 0x354   : > { %1735 = vst.msk [vmem:[#allocation2 + $0xb8] sm:$0xff] %vm1731_vm7, %v1726_v56  ;;  %2857 = vmatprep.subr.bf16.mxu1 %v1811_v57  ;;  %v3282_v56 = vld [vmem:[#allocation12 + $0x90] sm:$0xff]   ;;  %v3283_v57 = vld [vmem:[#allocation12 + $0x58] sm:$0xff]  }
 0x355   : > { %2858 = vmatpush3.bf16.msra.mxu1 %v1803_v58  ;;  %v3284_v58 = vld [vmem:[#allocation12 + $0xd8] sm:$0xff]  }
 0x357   : > { %v1812_v59 = vld [vmem:[#allocation2 + $0xf8] sm:$0xff] }
 0x358   : > { %2859 = vmatprep.subr.bf16.mxu1 %v1812_v59  ;;  %v3285_v59 = vld [vmem:[#allocation12 + $0x18] sm:$0xff]  }
 0x35b   : > { %v1804_v60 = vld [vmem:[#allocation2 + $0xb8] sm:$0xff] }
 0x35c   : > { %2860 = vmatpush3.bf16.msra.mxu1 %v1804_v60  ;;  %v3286_v60 = vld [vmem:[#allocation12 + $0x98] sm:$0xff]  }
 0x35d   : > { %3000 = vmatprep.subr.bf16.mxu1 %v3582_v2 }
 0x35f   : > { %1887 = vmatmul.mubr.bf16.vlgmr.msra.gmra.mrb[12].mxu1 %v1517_v51 }
 0x360   : > { %3001 = vmatpush3.bf16.msra.mxu1 %v3263_v1  ;;  %3016 = vmatprep.mubr.msk.bf16.mxu1 %vm3583_vm10, %v3582_v2  ;;  %v3290_v1 = vld [vmem:[#allocation12 + $0xa0] sm:$0xff]  }
 0x361   : > { %3002 = vmatprep.subr.bf16.mxu1 %v3582_v2 }
 0x364   : > { %3003 = vmatpush3.bf16.msra.mxu1 %v3264_v3  ;;  %v3292_v3 = vld [vmem:[#allocation12 + $0xe8] sm:$0xff]  }
 0x365   : > { %3004 = vmatprep.subr.bf16.mxu1 %v3582_v2 }
 0x368   : > { %3005 = vmatpush3.bf16.msra.mxu1 %v3265_v4  ;;  %v3293_v4 = vld [vmem:[#allocation12 + $0x28] sm:$0xff]  }
 0x369   : > { %3006 = vmatprep.subr.bf16.mxu1 %v3582_v2 }
 0x36c   : > { %3007 = vmatpush3.bf16.msra.mxu1 %v3266_v21  ;;  %v3294_v21 = vld [vmem:[#allocation12 + $0xa8] sm:$0xff]  }
 0x36d   : > { %3008 = vmatprep.subr.bf16.mxu1 %v3582_v2 }
 0x370   : > { %3009 = vmatpush3.bf16.msra.mxu1 %v3267_v18 }
 0x371   : > { %3010 = vmatprep.subr.bf16.mxu1 %v3582_v2 }
 0x374   : > { %3011 = vmatpush3.bf16.msra.mxu1 %v3268_v19 }
 0x375   : > { %3012 = vmatprep.subr.bf16.mxu1 %v3582_v2 }
 0x378   : > { %3013 = vmatpush3.bf16.msra.mxu1 %v3269_v20 }
 0x379   : > { %3014 = vmatprep.subr.bf16.mxu1 %v3582_v2  ;;  %v3291_v2 = vld [vmem:[#allocation12 + $0x68] sm:$0xff]  }
 0x37c   : > { %3015 = vmatpush3.bf16.msra.mxu1 %v3270_v22 }
 0x37d   : > { %2048 = vmatprep.subr.bf16.mxu1 %v3962_v9 }
 0x3f7   : > { %v2839_v50 = vpop.f32.mrb[8].mxu1 }
 0x3f8   : > { %v2840_v51 = vpop.f32.mrb[9].mxu1 }
 0x3f9   : > { %v2841_v5 = vadd.f32 %v2840_v51, %v2839_v50  ;;  %v2842_v6 = vpop.f32.mrb[10].mxu1  ;;  %v3295_v50 = vld [vmem:[#allocation12 + $0x70] sm:$0xff]  }
 0x3fa   : > { %v2843_v7 = vpop.f32.mrb[11].mxu1  ;;  %v3296_v51 = vld [vmem:[#allocation12 + $0xf0] sm:$0xff]  }
 0x3fb   : > { %v2844_v8 = vadd.f32 %v2843_v7, %v2842_v6  ;;  %v3298_v6 = vld [vmem:[#allocation12 + $0xb0] sm:$0xff]   ;;  %v3299_v7 = vld [vmem:[#allocation12 + $0x78] sm:$0xff]  }
 0x432   : > { %v2861_v10 = vpop.f32.mrb[12].mxu1 }
 0x433   : > { %v2862_v11 = vpop.f32.mrb[13].mxu1 }
 0x434   : > { %v2863_v12 = vadd.f32 %v2862_v11, %v2861_v10  ;;  %v2864_v13 = vpop.f32.mrb[14].mxu1  ;;  %v3301_v10 = vld [vmem:[#allocation12 + $0x38] sm:$0xff]  }
 0x435   : > { %v2865_v14 = vpop.f32.mrb[15].mxu1  ;;  %v3302_v11 = vld [vmem:[#allocation12 + $0xb8] sm:$0xff]  }
 0x436   : > { %v2866_v15 = vadd.f32 %v2865_v14, %v2864_v13  ;;  %v1889_v16 = vadd.f32 %v2863_v12, %v2841_v5  ;;  %v3297_v5 = vld [vmem:[#allocation12 + $0x30] sm:$0xff]  }
 0x438   : > { %1895 = vmax.xlane.f32.xlu0 %v1889_v16  ;;  %v1892_v17 = vadd.f32 %v2866_v15, %v2844_v8  ;;  %v3300_v8 = vld [vmem:[#allocation12 + $0xf8] sm:$0xff]  }
 0x43a   : > { %1897 = vmax.xlane.f32.xlu1 %v1892_v17 }
 0x4c5   : > { %v1896_v23 = vpop.xlane.xlu0 %1895 }
 0x4c6   : > { %v1899_v24 = vsub.f32 %v1889_v16, %v1896_v23 }
 0x4c7   : > { %v1898_v25 = vpop.xlane.xlu1 %1897 }
 0x4c8   : > { %v1901_v26 = vmul.f32 1.442695, %v1899_v24  ;;  %v1900_v27 = vsub.f32 %v1892_v17, %v1898_v25 }
 0x4ca   : > { %v1903_v28 = vmul.f32 1.442695, %v1900_v27  ;;  %3303 = vpow2.f32 %v1901_v26  ;;  %v2743_v27 = vld [vmem:[%s4087_s6] ss:$0 sm:$0xff] }
 0x4cc   : > { %3305 = vpow2.f32 %v1903_v28 }
 0x4d4   : > { %v3304_v29 = vpop.eup %3303 }
 0x4d6   : > { %v3306_v30 = vpop.eup %3305 }
 0x4d7   : > { %v1905_v31 = vpack.c.bf16 %v3306_v30, %v3304_v29 }
 0x4d9   : > { %3017 = vmatmul.mubr.bf16.vlgmr.msra.gmra.mrb[16].mxu1 %v1905_v31 }
 0x4da   : > { %2049 = vmatpush1.bf16.msra.mxu1 %v2016_v32  ;;  %2080 = vmatprep.mubr.bf16.mxu1 %v3962_v9 }
 0x4db   : > { %2050 = vmatprep.subr.bf16.mxu1 %v3962_v9 }
 0x4de   : > { %2051 = vmatpush1.bf16.msra.mxu1 %v2020_v33 }
 0x4df   : > { %2052 = vmatprep.subr.bf16.mxu1 %v2025_v34 }
 0x4e2   : > { %2053 = vmatpush1.bf16.msra.mxu1 %v3962_v9 }
 0x4e3   : > { %2054 = vmatprep.subr.bf16.mxu1 %v2029_v35 }
 0x4e6   : > { %2055 = vmatpush1.bf16.msra.mxu1 %v3962_v9 }
 0x4e7   : > { %2056 = vmatprep.subr.bf16.mxu1 %v3962_v9 }
 0x4ea   : > { %2057 = vmatpush1.bf16.msra.mxu1 %v3962_v9 }
 0x4eb   : > { %2058 = vmatprep.subr.bf16.mxu1 %v3962_v9 }
 0x4ee   : > { %2059 = vmatpush1.bf16.msra.mxu1 %v3962_v9 }
 0x4ef   : > { %2060 = vmatprep.subr.bf16.mxu1 %v3962_v9 }
 0x4f2   : > { %2061 = vmatpush1.bf16.msra.mxu1 %v3962_v9 }
 0x4f3   : > { %2062 = vmatprep.subr.bf16.mxu1 %v3962_v9 }
 0x4f6   : > { %2063 = vmatpush1.bf16.msra.mxu1 %v3962_v9  ;;  %v3277_v9 = vld [vmem:[#allocation12 + $0x8] sm:$0xff]  }
 0x4f7   : > { %2876 = vmatprep.subr.bf16.mxu1 %v3271_v36 }
 0x5ac   : > { %v2004_v47 = vpop.f32.mrb[16].mxu1 }
 0x5ad   : > { %3307 = vrcp.f32 %v2004_v47  ;;  %v3018_v48 = vpop.f32.mrb[17].mxu1 }
 0x5ae   : > { %v2007_v37 = vpop.f32.mrb[18].mxu1 }
 0x5af   : > { %3309 = vrcp.f32 %v2007_v37  ;;  %v3019_v38 = vpop.f32.mrb[19].mxu1 }
 0x5b7   : > { %v3308_v39 = vpop.eup %3307 }
 0x5b8   : > { %v2013_v41 = vmul.f32 %v3308_v39, %v3304_v29 }
 0x5b9   : > { %v3310_v40 = vpop.eup %3309 }
 0x5ba   : > { %v2014_v42 = vmul.f32 %v3310_v40, %v3306_v30 }
 0x5bc   : > { %v2015_v45 = vpack.c.bf16 %v2014_v42, %v2013_v41 }
 0x5be   : > { %2081 = vmatmul.mubr.bf16.vlgmr.msra.gmra.mrb[20].mxu1 %v2015_v45  ;;  %2124 = vmatmul.mubr.bf16.vlgmr.msra.gmra.mrb[72].mxu0 %v2015_v45 }
 0x5bf   : > { %2877 = vmatpush3.bf16.msra.mxu1 %v3273_v0  ;;  %2899 = vmatpush3.bf16.msra.mxu0 %v3274_v43 }
 0x5c0   : > { %2878 = vmatprep.subr.bf16.mxu1 %v3275_v46  ;;  %2900 = vmatprep.subr.bf16.mxu0 %v3276_v49 }
 0x5c3   : > { %2879 = vmatpush3.bf16.msra.mxu1 %v3277_v9  ;;  %2901 = vmatpush3.bf16.msra.mxu0 %v3278_v52 }
 0x5c4   : > { %2880 = vmatprep.subr.bf16.mxu1 %v3279_v53  ;;  %2902 = vmatprep.subr.bf16.mxu0 %v3280_v54 }
 0x5c7   : > { %2881 = vmatpush3.bf16.msra.mxu1 %v3281_v55  ;;  %2903 = vmatpush3.bf16.msra.mxu0 %v3282_v56 }
 0x5c8   : > { %2882 = vmatprep.subr.bf16.mxu1 %v3283_v57  ;;  %2904 = vmatprep.subr.bf16.mxu0 %v3284_v58 }
 0x5cb   : > { %2883 = vmatpush3.bf16.msra.mxu1 %v3285_v59  ;;  %2905 = vmatpush3.bf16.msra.mxu0 %v3286_v60 }
 0x5cc   : > { %2884 = vmatprep.subr.bf16.mxu1 %v3287_v61  ;;  %2906 = vmatprep.subr.bf16.mxu0 %v3288_v62 }
 0x5cf   : > { %2885 = vmatpush3.bf16.msra.mxu1 %v3289_v63  ;;  %2907 = vmatpush3.bf16.msra.mxu0 %v3290_v1 }
 0x5d0   : > { %2886 = vmatprep.subr.bf16.mxu1 %v3291_v2  ;;  %2908 = vmatprep.subr.bf16.mxu0 %v3292_v3 }
 0x5d3   : > { %2887 = vmatpush3.bf16.msra.mxu1 %v3293_v4  ;;  %2909 = vmatpush3.bf16.msra.mxu0 %v3294_v21 }
 0x5d4   : > { %2888 = vmatprep.subr.bf16.mxu1 %v3295_v50  ;;  %2910 = vmatprep.subr.bf16.mxu0 %v3296_v51 }
 0x5d7   : > { %2889 = vmatpush3.bf16.msra.mxu1 %v3297_v5  ;;  %2911 = vmatpush3.bf16.msra.mxu0 %v3298_v6 }
 0x5d8   : > { %2890 = vmatprep.subr.bf16.mxu1 %v3299_v7  ;;  %2912 = vmatprep.subr.bf16.mxu0 %v3300_v8 }
 0x5db   : > { %2891 = vmatpush3.bf16.msra.mxu1 %v3301_v10  ;;  %2913 = vmatpush3.bf16.msra.mxu0 %v3302_v11 }
 0x691   : > { %v2082_v12 = vpop.f32.mrb[20].mxu1  ;;  %v2125_v13 = vpop.f32.mrb[72].mxu0 }
 0x692   : > { %v2084_v14 = vpop.f32.mrb[21].mxu1  ;;  %v2127_v15 = vpop.f32.mrb[73].mxu0 }
 0x693   : > { %v2086_v16 = vpop.f32.mrb[22].mxu1  ;;  %v2129_v17 = vpop.f32.mrb[74].mxu0 }
 0x694   : > { %v2134_v18 = vpack.c.bf16 %v2086_v16, %v2082_v12  ;;  %v2136_v19 = vpack.c.bf16 %v2129_v17, %v2125_v13  ;;  %v2088_v20 = vpop.f32.mrb[23].mxu1  ;;  %v2131_v22 = vpop.f32.mrb[75].mxu0 }
 0x695   : > { %v2135_v23 = vpack.c.bf16 %v2088_v20, %v2084_v14  ;;  %v2137_v24 = vpack.c.bf16 %v2131_v22, %v2127_v15 }
 0x697   : > { %2433 = vmatprep.mubr.bf16.mxu1 %v2135_v23  ;;  %2474 = vmatprep.mubr.bf16.mxu0 %v2137_v24 }
 0x698   : > { %2434 = vmatmul.mubr.bf16.vlgmr.msra.gmra.mrb[24].mxu1 %v2134_v18  ;;  %2475 = vmatmul.mubr.bf16.vlgmr.msra.gmra.mrb[76].mxu0 %v2136_v19 }
 0x76b   : > { %v2892_v25 = vpop.f32.mrb[24].mxu1  ;;  %v2914_v26 = vpop.f32.mrb[76].mxu0 }
 0x76c   : > { %v2893_v28 = vpop.f32.mrb[25].mxu1  ;;  %v2915_v29 = vpop.f32.mrb[77].mxu0 }
 0x76d   : > { %v2894_v30 = vadd.f32 %v2893_v28, %v2892_v25  ;;  %v2916_v31 = vadd.f32 %v2915_v29, %v2914_v26  ;;  %v2895_v32 = vpop.f32.mrb[26].mxu1  ;;  %v2917_v33 = vpop.f32.mrb[78].mxu0 }
 0x76e   : > { %v2896_v34 = vpop.f32.mrb[27].mxu1  ;;  %v2918_v35 = vpop.f32.mrb[79].mxu0 }
 0x76f   : > { %v2436_v36 = vadd.f32 %v2894_v30, %v2743_v27  ;;  %v2897_v44 = vadd.f32 %v2896_v34, %v2895_v32  ;;  %v2919_v47 = vadd.f32 %v2918_v35, %v2917_v33 }
 0x771   : > { %v2477_v48 = vadd.f32 %v2916_v31, %v2436_v36  ;;  %v2439_v37 = vadd.f32 %v2897_v44, %v2743_v27 }
 0x773   : > { %2483 = vst [vmem:[%s369_s11] sm:$0xff] %v2477_v48  ;;  %v2480_v38 = vadd.f32 %v2919_v47, %v2439_v37 }
 0x775   : > { %2484 = vst [vmem:[%s369_s11 + $0x8] sm:$0xff] %v2480_v38 }
 0x776   : > { %3495 = shalt.err (!%p3492_p8)
}
 0x777   : > { %s3496_s10 = scalar_lea.hbm %s4037_s29, 256  ;;  %s3500_s13 = scalar_lea.hbm %s4088_s7, 512 }
 0x778   : > { %p3497_p6 = scmp.ne.s32.totalorder %s4037_s29, %s3496_s10  ;;  %p3501_p3 = scmp.lt.u32.totalorder %s4037_s29, %s4088_s7 }
 0x779   : > { %p3502_p5 = scmp.lt.u32.totalorder %s3500_s13, %s3496_s10  ;;  %p3504_p7 = scmp.lt.u32.totalorder %s3496_s10, %s4037_s29 }
 0x77a   : > { %p3498_p10 = pnand %p3497_p6, %p4109_p4 }
 0x77b   : > { %p3503_p9 = por %p3502_p5, %p3501_p3 }
 0x77c   : > { %p3499_p11 = pneg %p3498_p10 }
 0x77d   : > { %p3505_p12 = por %p3504_p7, %p3503_p9 }
 0x77f   : > { %p3506_p1 = pnand %p3505_p12, %p3499_p11 }
 0x781   : > { %3509 = shalt.err (!%p3506_p1)
}
 0x782   : > { %s3585_s28 = smov 128   ;;  %s3586_s8 = smov 8  }
 0x783   : > { %3042 = dma.vmem_to_hbm [thread:$0]  (%p4109_p4), %s4032_s1, 256, %s4037_s29, %s2486_s12, %s3585_s28, %s3585_s28, %s3586_s8  }
 0x784 PF: > { %s2514_s17 = sand.u32 1, %s3548_s24   ;;  %p4110_p13 = scmp.ne.s32.totalorder %s4100_s14, 0 }
 0x785   : > { %p4111_p0 = scmp.ge.s32.totalorder %s3560_s27, 2  ;;  %s2515_s30 = scalar_lea.sflag [#allocation6], %s2514_s17 }
 0x787   : > { %p3065_p2 = pnand %p4111_p0, %p4110_p13 }
 0x789   : > { %3543 = dma.done.wait (!%p3065_p2), %s2515_s30, 256  }
 0x78a   : > { %3545 = vsyncadd (!%p3065_p2), %s2515_s30, 4294967040  ;;  %p23_p8 = scmp.ge.s32.totalorder %s3794_s19, 4   ;;  %s4112_s24 = smov %s3552_s25 }
 0x78b   : > { %s4113_s25 = smov %s3556_s26  ;;  %s4114_s26 = smov %s3806_s21 }
 0x78c   : > { %s4115_s27 = smov %s3794_s19  ;;  %25 = sbr.rel (!%p23_p8) target bundleno = 10 (0xa), region = 113 }
 0x793   :  { %2520 = vsyncpa [#allocation5], 1 }
 0x794   :  { %2522 = vsyncpa [#allocation5 + $0x1], 1 }
 0x795   :  { %2523 = vsyncpa [#allocation8], 1 }
 0x796   :  { %2524 = vsyncpa [#allocation11], 1 }
 0x797   :  { %2525 = vsyncpa [#allocation14], 1 }
 0x798   :  { %2526 = vsyncpa [#allocation6], 1 }
 0x799   :  { %2528 = vsyncpa [#allocation6 + $0x1], 1 }

</bundles_post_ra>
